<compile_context>
chip_gen: v7x
topology: tpu7x:2x2x1
jax: 0.10.0
libtpu: 0.0.40
codegen_flags: <defaults>
</compile_context>

<pallas_src>
import jax
import jax.numpy as jnp
import numpy as np
from jax.experimental import pallas as pl
from jax.experimental.pallas import tpu as pltpu

BN_EPS = 1e-5
_LANES = 128


def _pad8(n):
    return ((n + 7) // 8) * 8


def pack_params(params, batch, n_atom):
    """Packs every parameter into one (rows, 128) f32 slab + a static row/col layout.

    Weights are stored as zero-padded (128, 128) tiles (gate weight: (256, 128)) so the
    kernel can run every matmul at full 128-lane width without masked lane slices.
    """
    layers = params["layers"]
    n_layer = len(layers)
    project_residual = "wsc" in params
    bn_rows = batch * n_atom
    assert 2 * n_layer <= _LANES

    layout = {"layers": [], "project_residual": project_residual}
    rows = 0

    def alloc(r):
        nonlocal rows
        off = rows
        rows += _pad8(r)
        return off

    for (w, _b, _g, _be) in layers:
        d_in, d_out = int(w.shape[0]), int(w.shape[1])
        assert d_in <= _LANES and d_out <= _LANES, "feature dims must fit one lane tile"
        layout["layers"].append({"d_in": d_in, "d_out": d_out, "w_off": alloc(_LANES)})
    if project_residual:
        layout["wsc_off"] = alloc(_LANES)
    layout["wg_off"] = alloc(2 * _LANES)            # fused [wci; wco] gate weight

    bias_off = alloc(n_layer + 1)                   # one row per linear bias + gate bias
    for i in range(n_layer):
        layout["layers"][i]["b_row"] = bias_off + i
    layout["bg_row"] = bias_off + n_layer

    layout["bn_off"] = alloc(bn_rows)               # gamma_i at col 2i, beta_i at col 2i+1
    layout["bn_rows"] = bn_rows

    slab = np.zeros((max(_pad8(rows), 8), _LANES), np.float32)

    for i, (w, b, g, be) in enumerate(layers):
        L = layout["layers"][i]
        slab[L["w_off"]:L["w_off"] + L["d_in"], :L["d_out"]] = np.asarray(w, np.float32)
        slab[L["b_row"], :L["d_out"]] = np.asarray(b, np.float32).reshape(-1)
        # Per-atom gamma/beta tiled over the batch (rows are batch-major: r = b*N + n).
        slab[layout["bn_off"]:layout["bn_off"] + bn_rows, 2 * i] = \
            np.tile(np.asarray(g, np.float32).reshape(-1), batch)
        slab[layout["bn_off"]:layout["bn_off"] + bn_rows, 2 * i + 1] = \
            np.tile(np.asarray(be, np.float32).reshape(-1), batch)

    if project_residual:
        wsc = np.asarray(params["wsc"], np.float32)
        slab[layout["wsc_off"]:layout["wsc_off"] + wsc.shape[0], :wsc.shape[1]] = wsc

    out_dim = int(layers[-1][0].shape[1])
    wci = np.asarray(params["wci"], np.float32)
    wco = np.asarray(params["wco"], np.float32)
    slab[layout["wg_off"]:layout["wg_off"] + out_dim, :out_dim] = wci
    slab[layout["wg_off"] + _LANES:layout["wg_off"] + _LANES + out_dim, :out_dim] = wco
    bg = (np.asarray(params["bci"], np.float32).reshape(-1)
          + np.asarray(params["bco"], np.float32).reshape(-1))
    slab[layout["bg_row"], :out_dim] = bg

    return jnp.asarray(slab), layout


def _make_gcn_block_kernel(layout, batch, n_atom, matmul_dtype):
    n_layer = len(layout["layers"])
    project_residual = layout["project_residual"]
    bn_off, bn_rows = layout["bn_off"], layout["bn_rows"]
    N = n_atom

    def mxu(a, b):
        # bf16 MXU operands (v5e/v6e/v7x native rate); accumulation always f32.
        if matmul_dtype is not None:
            a = a.astype(matmul_dtype)
            b = b.astype(matmul_dtype)
        return jnp.dot(a, b, preferred_element_type=jnp.float32)

    def kernel(x_ref, adj_ref, slab_ref, out_ref):
        x = x_ref[...]            # (B*N, 128), lanes >= in_dim are zero
        h = x
        for i in range(n_layer):
            L = layout["layers"][i]
            d_out = L["d_out"]
            w = slab_ref[L["w_off"]:L["w_off"] + _LANES, :]       # (128, 128), zero-padded
            b = slab_ref[L["b_row"]:L["b_row"] + 1, :]            # (1, 128)

            # Linear: full-lane MXU matmul; padded lanes of h hit zero weight rows.
            h = mxu(h, w) + b                                     # (B*N, 128)

            # Per-molecule neighbor aggregation (no block-diagonal blow-up).
            parts = [mxu(adj_ref[bi], h[bi * N:(bi + 1) * N, :]) for bi in range(batch)]
            h = jnp.concatenate(parts, axis=0)                    # (B*N, 128)

            # BatchNorm1d(n_atom), training-mode statistics: per-atom over (batch, feature).
            # Feature-reduce first (rowsum on XLU), then a tiny cross-batch add.
            # Padded lanes are zero here, so dividing by batch*d_out is exact.
            inv_cnt = 1.0 / float(batch * d_out)
            s1 = jnp.sum(h, axis=1, keepdims=True)                # (B*N, 1)  sum x
            s2 = jnp.sum(h * h, axis=1, keepdims=True)            # (B*N, 1)  sum x^2
            a1 = s1[0:N, :]
            a2 = s2[0:N, :]
            for bi in range(1, batch):
                a1 = a1 + s1[bi * N:(bi + 1) * N, :]
                a2 = a2 + s2[bi * N:(bi + 1) * N, :]
            mean_a = a1 * inv_cnt                                 # (N, 1)
            var_a = a2 * inv_cnt - mean_a * mean_a                # E[x^2] - mean^2
            inv_a = jax.lax.rsqrt(var_a + BN_EPS)
            mean = jnp.concatenate([mean_a] * batch, axis=0)      # (B*N, 1)
            inv = jnp.concatenate([inv_a] * batch, axis=0)        # (B*N, 1)
            gamma = slab_ref[bn_off:bn_off + bn_rows, 2 * i:2 * i + 1]
            beta = slab_ref[bn_off:bn_off + bn_rows, 2 * i + 1:2 * i + 2]
            h = (h - mean) * (gamma * inv) + beta
            if i != n_layer - 1:                                  # ReLU on all but last layer
                h = jnp.maximum(h, 0.0)

        # Gated skip connection — single fused gate matmul.
        res = x
        if project_residual:
            wsc = slab_ref[layout["wsc_off"]:layout["wsc_off"] + _LANES, :]
            res = mxu(res, wsc)                                   # no bias
        wg = slab_ref[layout["wg_off"]:layout["wg_off"] + 2 * _LANES, :]   # (256, 128)
        bg = slab_ref[layout["bg_row"]:layout["bg_row"] + 1, :]            # bci + bco
        gate_in = jnp.concatenate([res, h], axis=1)                        # (B*N, 256)
        z = jax.nn.sigmoid(mxu(gate_in, wg) + bg)
        out = z * h + (1.0 - z) * res
        out_ref[...] = jnp.maximum(out, 0.0)                      # final ReLU of GCNBlock

    return kernel


def gcn_block_forward(x, adj, params, matmul_dtype=jnp.bfloat16):
    """Runs the fused GCNBlock kernel. Returns (out, adj) like the PyTorch module."""
    B, N, in_dim = x.shape
    out_dim = int(params["layers"][-1][0].shape[1])
    BN = B * N

    slab, layout = pack_params(params, B, N)

    # Host/XLA-side layout plumbing (free): lane-dense (B*N, 128) input slab.
    x2d = jnp.asarray(x, jnp.float32).reshape(BN, in_dim)
    x_pad = jnp.pad(x2d, ((0, 0), (0, _LANES - in_dim)))
    adj_f = jnp.asarray(adj, jnp.float32)                 # (B, N, N) — no block-diag blow-up

    kernel = _make_gcn_block_kernel(layout, B, N, matmul_dtype)

    # VMEM budget from actual residency (+ generous activation headroom), clamped to the
    # v7x 64 MiB physical ceiling (v5e/v6e have 128 MiB physical, 16/32 MiB default scoped).
    io_bytes = 4 * (x_pad.size + adj_f.size + slab.size + BN * _LANES)
    act_bytes = 4 * BN * (2 * _LANES) * 8
    vmem_limit = int(min(64 << 20, max(16 << 20, 2 * io_bytes + act_bytes)))

    out_pad = pl.pallas_call(
        kernel,
        out_shape=jax.ShapeDtypeStruct((BN, _LANES), jnp.float32),
        in_specs=[pl.BlockSpec(memory_space=pltpu.MemorySpace.VMEM)] * 3,
        out_specs=pl.BlockSpec(memory_space=pltpu.MemorySpace.VMEM),
        compiler_params=pltpu.CompilerParams(vmem_limit_bytes=vmem_limit),
    )(x_pad, adj_f, slab)
    return out_pad[:, :out_dim].reshape(B, N, out_dim), adj


def init_params(key, n_layer, in_dim, hidden_dim, out_dim, n_atom):
    """Deterministic synthetic parameters matching the PyTorch module's shapes."""
    keys = jax.random.split(key, 4 * n_layer + 8)
    ki = iter(range(len(keys)))

    def xavier(k, fan_in, fan_out):
        limit = float(np.sqrt(6.0 / (fan_in + fan_out)))
        return jax.random.uniform(k, (fan_in, fan_out), jnp.float32, -limit, limit)

    def lin_bias(k, fan_in, fan_out):
        limit = float(1.0 / np.sqrt(fan_in))
        return jax.random.uniform(k, (1, fan_out), jnp.float32, -limit, limit)

    layers = []
    for i in range(n_layer):
        d_in = in_dim if i == 0 else hidden_dim
        d_out = out_dim if i == n_layer - 1 else hidden_dim
        w = xavier(keys[next(ki)], d_in, d_out)          # stored as (in, out)
        b = lin_bias(keys[next(ki)], d_in, d_out)        # (1, out)
        g = jnp.ones((n_atom, 1), jnp.float32)           # BN gamma
        be = jnp.zeros((n_atom, 1), jnp.float32)         # BN beta
        next(ki); next(ki)
        layers.append((w, b, g, be))

    params = {"layers": layers}
    if in_dim != out_dim:
        params["wsc"] = xavier(keys[next(ki)], in_dim, out_dim)   # no bias
    params["wci"] = xavier(keys[next(ki)], out_dim, out_dim)
    params["bci"] = lin_bias(keys[next(ki)], out_dim, out_dim)
    params["wco"] = xavier(keys[next(ki)], out_dim, out_dim)
    params["bco"] = lin_bias(keys[next(ki)], out_dim, out_dim)
    return params


def reference_forward(x, adj, params):
    """Pure-JAX reference mirroring the PyTorch forward (training-mode BatchNorm)."""
    h = x
    n_layer = len(params["layers"])
    for i, (w, b, g, be) in enumerate(params["layers"]):
        h = jnp.einsum('bni,io->bno', h, w) + b
        h = jnp.einsum('bmn,bno->bmo', adj, h)
        mean = jnp.mean(h, axis=(0, 2), keepdims=True)
        var = jnp.mean((h - mean) ** 2, axis=(0, 2), keepdims=True)
        h = (h - mean) / jnp.sqrt(var + BN_EPS) * g + be
        if i != n_layer - 1:
            h = jnp.maximum(h, 0.0)
    res = x
    if "wsc" in params:
        res = jnp.einsum('bni,io->bno', res, params["wsc"])
    z = jax.nn.sigmoid(jnp.einsum('bno,op->bnp', res, params["wci"]) + params["bci"]
                       + jnp.einsum('bno,op->bnp', h, params["wco"]) + params["bco"])
    out = z * h + (1.0 - z) * res
    return jnp.maximum(out, 0.0), adj


if __name__ == "__main__":
    B, n_atom, in_dim, hidden_dim, out_dim, n_layer = 2, 16, 8, 32, 16, 3

    key = jax.random.PRNGKey(0)
    kx, kadj, kp = jax.random.split(key, 3)
    x = jax.random.normal(kx, (B, n_atom, in_dim), jnp.float32)
    adj = jax.random.uniform(kadj, (B, n_atom, n_atom), jnp.float32)
    adj = (adj + jnp.transpose(adj, (0, 2, 1))) * 0.5  # deterministic symmetric adjacency

    params = init_params(kp, n_layer, in_dim, hidden_dim, out_dim, n_atom)
    ref, _ = reference_forward(x, adj, params)

    # Exact-path check: f32 MXU operands.
    out_f32, _ = gcn_block_forward(x, adj, params, matmul_dtype=None)
    out_f32 = jax.block_until_ready(out_f32)
    np.testing.assert_allclose(np.asarray(out_f32), np.asarray(ref), rtol=1e-4, atol=1e-4)

    # Default path smoke-check: bf16 MXU operands, f32 accumulation / elementwise.
    out_bf16, _ = gcn_block_forward(x, adj, params)
    out_bf16 = jax.block_until_ready(out_bf16)
    np.testing.assert_allclose(np.asarray(out_bf16), np.asarray(ref), rtol=1e-1, atol=1e-1)

    print("KERNEL_OK")
</pallas_src>

<mosaic_0001>
module attributes {stable_mosaic.version = 11 : i64} {
  func.func @kernel(%arg0: memref<32x128xf32, #tpu.memory_space<vmem>>, %arg1: memref<2x16x16xf32, #tpu.memory_space<vmem>>, %arg2: memref<808x128xf32, #tpu.memory_space<vmem>>, %arg3: memref<32x128xf32, #tpu.memory_space<vmem>>) attributes {dimension_semantics = [], scalar_prefetch = 0 : i64, scratch_operands = 0 : i64, tpu.core_type = #tpu.core_type<tc>} {
    %c0 = arith.constant 0 : index
    %c0_0 = arith.constant 0 : index
    %0 = vector.load %arg0[%c0, %c0_0] : memref<32x128xf32, #tpu.memory_space<vmem>>, vector<32x128xf32>
    %c0_1 = arith.constant 0 : index
    %c0_2 = arith.constant 0 : index
    %1 = vector.load %arg2[%c0_1, %c0_2] : memref<808x128xf32, #tpu.memory_space<vmem>>, vector<128x128xf32>
    %c768 = arith.constant 768 : index
    %c0_3 = arith.constant 0 : index
    %2 = vector.load %arg2[%c768, %c0_3] : memref<808x128xf32, #tpu.memory_space<vmem>>, vector<1x128xf32>
    %cst = arith.constant dense<0.000000e+00> : vector<32x128xf32>
    %3 = tpu.matmul %0, %1, %cst {dimension_numbers = #tpu.dot_dimension_numbers<[1], [0], [0], [1], [0, 0, 1, 1], [], []>} : vector<32x128xf32>, vector<128x128xf32>, vector<32x128xf32> -> vector<32x128xf32>
    %4 = vector.broadcast %2 : vector<1x128xf32> to vector<32x128xf32>
    %5 = arith.addf %3, %4 : vector<32x128xf32>
    %c0_4 = arith.constant 0 : index
    %c0_5 = arith.constant 0 : index
    %c0_6 = arith.constant 0 : index
    %6 = vector.load %arg1[%c0_4, %c0_5, %c0_6] : memref<2x16x16xf32, #tpu.memory_space<vmem>>, vector<1x16x16xf32>
    %7 = vector.shape_cast %6 : vector<1x16x16xf32> to vector<16x16xf32>
    %8 = vector.extract_strided_slice %5 {offsets = [0, 0], sizes = [16, 128], strides = [1, 1]} : vector<32x128xf32> to vector<16x128xf32>
    %cst_7 = arith.constant dense<0.000000e+00> : vector<16x128xf32>
    %9 = tpu.matmul %7, %8, %cst_7 {dimension_numbers = #tpu.dot_dimension_numbers<[1], [0], [0], [1], [0, 0, 1, 1], [], []>} : vector<16x16xf32>, vector<16x128xf32>, vector<16x128xf32> -> vector<16x128xf32>
    %c1 = arith.constant 1 : index
    %c0_8 = arith.constant 0 : index
    %c0_9 = arith.constant 0 : index
    %10 = vector.load %arg1[%c1, %c0_8, %c0_9] : memref<2x16x16xf32, #tpu.memory_space<vmem>>, vector<1x16x16xf32>
    %11 = vector.shape_cast %10 : vector<1x16x16xf32> to vector<16x16xf32>
    %12 = vector.extract_strided_slice %5 {offsets = [16, 0], sizes = [16, 128], strides = [1, 1]} : vector<32x128xf32> to vector<16x128xf32>
    %cst_10 = arith.constant dense<0.000000e+00> : vector<16x128xf32>
    %13 = tpu.matmul %11, %12, %cst_10 {dimension_numbers = #tpu.dot_dimension_numbers<[1], [0], [0], [1], [0, 0, 1, 1], [], []>} : vector<16x16xf32>, vector<16x128xf32>, vector<16x128xf32> -> vector<16x128xf32>
    %14 = tpu.concatenate %9, %13 in 0 : vector<16x128xf32>, vector<16x128xf32> -> vector<32x128xf32>
    %cst_11 = arith.constant dense<0.000000e+00> : vector<32xf32>
    %15 = vector.multi_reduction <add>, %14, %cst_11 [1] : vector<32x128xf32> to vector<32xf32>
    %16 = vector.shape_cast %15 : vector<32xf32> to vector<32x1xf32>
    %17 = arith.mulf %14, %14 : vector<32x128xf32>
    %cst_12 = arith.constant dense<0.000000e+00> : vector<32xf32>
    %18 = vector.multi_reduction <add>, %17, %cst_12 [1] : vector<32x128xf32> to vector<32xf32>
    %19 = vector.shape_cast %18 : vector<32xf32> to vector<32x1xf32>
    %20 = vector.extract_strided_slice %16 {offsets = [0, 0], sizes = [16, 1], strides = [1, 1]} : vector<32x1xf32> to vector<16x1xf32>
    %21 = vector.extract_strided_slice %19 {offsets = [0, 0], sizes = [16, 1], strides = [1, 1]} : vector<32x1xf32> to vector<16x1xf32>
    %22 = vector.extract_strided_slice %16 {offsets = [16, 0], sizes = [16, 1], strides = [1, 1]} : vector<32x1xf32> to vector<16x1xf32>
    %23 = arith.addf %20, %22 : vector<16x1xf32>
    %24 = vector.extract_strided_slice %19 {offsets = [16, 0], sizes = [16, 1], strides = [1, 1]} : vector<32x1xf32> to vector<16x1xf32>
    %25 = arith.addf %21, %24 : vector<16x1xf32>
    %cst_13 = arith.constant 1.562500e-02 : f32
    %26 = vector.broadcast %cst_13 : f32 to vector<16x1xf32>
    %27 = arith.mulf %23, %26 : vector<16x1xf32>
    %cst_14 = arith.constant 1.562500e-02 : f32
    %28 = vector.broadcast %cst_14 : f32 to vector<16x1xf32>
    %29 = arith.mulf %25, %28 : vector<16x1xf32>
    %30 = arith.mulf %27, %27 : vector<16x1xf32>
    %31 = arith.subf %29, %30 : vector<16x1xf32>
    %cst_15 = arith.constant 9.99999974E-6 : f32
    %32 = vector.broadcast %cst_15 : f32 to vector<16x1xf32>
    %33 = arith.addf %31, %32 : vector<16x1xf32>
    %34 = math.rsqrt %33 : vector<16x1xf32>
    %35 = tpu.concatenate %27, %27 in 0 : vector<16x1xf32>, vector<16x1xf32> -> vector<32x1xf32>
    %36 = tpu.concatenate %34, %34 in 0 : vector<16x1xf32>, vector<16x1xf32> -> vector<32x1xf32>
    %c776 = arith.constant 776 : index
    %c0_16 = arith.constant 0 : index
    %37 = vector.load %arg2[%c776, %c0_16] : memref<808x128xf32, #tpu.memory_space<vmem>>, vector<32x1xf32>
    %c776_17 = arith.constant 776 : index
    %c1_18 = arith.constant 1 : index
    %38 = vector.load %arg2[%c776_17, %c1_18] : memref<808x128xf32, #tpu.memory_space<vmem>>, vector<32x1xf32>
    %39 = vector.broadcast %35 : vector<32x1xf32> to vector<32x128xf32>
    %40 = arith.subf %14, %39 : vector<32x128xf32>
    %41 = arith.mulf %37, %36 : vector<32x1xf32>
    %42 = vector.broadcast %41 : vector<32x1xf32> to vector<32x128xf32>
    %43 = arith.mulf %40, %42 : vector<32x128xf32>
    %44 = vector.broadcast %38 : vector<32x1xf32> to vector<32x128xf32>
    %45 = arith.addf %43, %44 : vector<32x128xf32>
    %cst_19 = arith.constant 0.000000e+00 : f32
    %46 = vector.broadcast %cst_19 : f32 to vector<32x128xf32>
    %47 = arith.maximumf %45, %46 : vector<32x128xf32>
    %c128 = arith.constant 128 : index
    %c0_20 = arith.constant 0 : index
    %48 = vector.load %arg2[%c128, %c0_20] : memref<808x128xf32, #tpu.memory_space<vmem>>, vector<128x128xf32>
    %c769 = arith.constant 769 : index
    %c0_21 = arith.constant 0 : index
    %49 = vector.load %arg2[%c769, %c0_21] : memref<808x128xf32, #tpu.memory_space<vmem>>, vector<1x128xf32>
    %cst_22 = arith.constant dense<0.000000e+00> : vector<32x128xf32>
    %50 = tpu.matmul %47, %48, %cst_22 {dimension_numbers = #tpu.dot_dimension_numbers<[1], [0], [0], [1], [0, 0, 1, 1], [], []>} : vector<32x128xf32>, vector<128x128xf32>, vector<32x128xf32> -> vector<32x128xf32>
    %51 = vector.broadcast %49 : vector<1x128xf32> to vector<32x128xf32>
    %52 = arith.addf %50, %51 : vector<32x128xf32>
    %c0_23 = arith.constant 0 : index
    %c0_24 = arith.constant 0 : index
    %c0_25 = arith.constant 0 : index
    %53 = vector.load %arg1[%c0_23, %c0_24, %c0_25] : memref<2x16x16xf32, #tpu.memory_space<vmem>>, vector<1x16x16xf32>
    %54 = vector.shape_cast %53 : vector<1x16x16xf32> to vector<16x16xf32>
    %55 = vector.extract_strided_slice %52 {offsets = [0, 0], sizes = [16, 128], strides = [1, 1]} : vector<32x128xf32> to vector<16x128xf32>
    %cst_26 = arith.constant dense<0.000000e+00> : vector<16x128xf32>
    %56 = tpu.matmul %54, %55, %cst_26 {dimension_numbers = #tpu.dot_dimension_numbers<[1], [0], [0], [1], [0, 0, 1, 1], [], []>} : vector<16x16xf32>, vector<16x128xf32>, vector<16x128xf32> -> vector<16x128xf32>
    %c1_27 = arith.constant 1 : index
    %c0_28 = arith.constant 0 : index
    %c0_29 = arith.constant 0 : index
    %57 = vector.load %arg1[%c1_27, %c0_28, %c0_29] : memref<2x16x16xf32, #tpu.memory_space<vmem>>, vector<1x16x16xf32>
    %58 = vector.shape_cast %57 : vector<1x16x16xf32> to vector<16x16xf32>
    %59 = vector.extract_strided_slice %52 {offsets = [16, 0], sizes = [16, 128], strides = [1, 1]} : vector<32x128xf32> to vector<16x128xf32>
    %cst_30 = arith.constant dense<0.000000e+00> : vector<16x128xf32>
    %60 = tpu.matmul %58, %59, %cst_30 {dimension_numbers = #tpu.dot_dimension_numbers<[1], [0], [0], [1], [0, 0, 1, 1], [], []>} : vector<16x16xf32>, vector<16x128xf32>, vector<16x128xf32> -> vector<16x128xf32>
    %61 = tpu.concatenate %56, %60 in 0 : vector<16x128xf32>, vector<16x128xf32> -> vector<32x128xf32>
    %cst_31 = arith.constant dense<0.000000e+00> : vector<32xf32>
    %62 = vector.multi_reduction <add>, %61, %cst_31 [1] : vector<32x128xf32> to vector<32xf32>
    %63 = vector.shape_cast %62 : vector<32xf32> to vector<32x1xf32>
    %64 = arith.mulf %61, %61 : vector<32x128xf32>
    %cst_32 = arith.constant dense<0.000000e+00> : vector<32xf32>
    %65 = vector.multi_reduction <add>, %64, %cst_32 [1] : vector<32x128xf32> to vector<32xf32>
    %66 = vector.shape_cast %65 : vector<32xf32> to vector<32x1xf32>
    %67 = vector.extract_strided_slice %63 {offsets = [0, 0], sizes = [16, 1], strides = [1, 1]} : vector<32x1xf32> to vector<16x1xf32>
    %68 = vector.extract_strided_slice %66 {offsets = [0, 0], sizes = [16, 1], strides = [1, 1]} : vector<32x1xf32> to vector<16x1xf32>
    %69 = vector.extract_strided_slice %63 {offsets = [16, 0], sizes = [16, 1], strides = [1, 1]} : vector<32x1xf32> to vector<16x1xf32>
    %70 = arith.addf %67, %69 : vector<16x1xf32>
    %71 = vector.extract_strided_slice %66 {offsets = [16, 0], sizes = [16, 1], strides = [1, 1]} : vector<32x1xf32> to vector<16x1xf32>
    %72 = arith.addf %68, %71 : vector<16x1xf32>
    %cst_33 = arith.constant 1.562500e-02 : f32
    %73 = vector.broadcast %cst_33 : f32 to vector<16x1xf32>
    %74 = arith.mulf %70, %73 : vector<16x1xf32>
    %cst_34 = arith.constant 1.562500e-02 : f32
    %75 = vector.broadcast %cst_34 : f32 to vector<16x1xf32>
    %76 = arith.mulf %72, %75 : vector<16x1xf32>
    %77 = arith.mulf %74, %74 : vector<16x1xf32>
    %78 = arith.subf %76, %77 : vector<16x1xf32>
    %cst_35 = arith.constant 9.99999974E-6 : f32
    %79 = vector.broadcast %cst_35 : f32 to vector<16x1xf32>
    %80 = arith.addf %78, %79 : vector<16x1xf32>
    %81 = math.rsqrt %80 : vector<16x1xf32>
    %82 = tpu.concatenate %74, %74 in 0 : vector<16x1xf32>, vector<16x1xf32> -> vector<32x1xf32>
    %83 = tpu.concatenate %81, %81 in 0 : vector<16x1xf32>, vector<16x1xf32> -> vector<32x1xf32>
    %c776_36 = arith.constant 776 : index
    %c2 = arith.constant 2 : index
    %84 = vector.load %arg2[%c776_36, %c2] : memref<808x128xf32, #tpu.memory_space<vmem>>, vector<32x1xf32>
    %c776_37 = arith.constant 776 : index
    %c3 = arith.constant 3 : index
    %85 = vector.load %arg2[%c776_37, %c3] : memref<808x128xf32, #tpu.memory_space<vmem>>, vector<32x1xf32>
    %86 = vector.broadcast %82 : vector<32x1xf32> to vector<32x128xf32>
    %87 = arith.subf %61, %86 : vector<32x128xf32>
    %88 = arith.mulf %84, %83 : vector<32x1xf32>
    %89 = vector.broadcast %88 : vector<32x1xf32> to vector<32x128xf32>
    %90 = arith.mulf %87, %89 : vector<32x128xf32>
    %91 = vector.broadcast %85 : vector<32x1xf32> to vector<32x128xf32>
    %92 = arith.addf %90, %91 : vector<32x128xf32>
    %cst_38 = arith.constant 0.000000e+00 : f32
    %93 = vector.broadcast %cst_38 : f32 to vector<32x128xf32>
    %94 = arith.maximumf %92, %93 : vector<32x128xf32>
    %c256 = arith.constant 256 : index
    %c0_39 = arith.constant 0 : index
    %95 = vector.load %arg2[%c256, %c0_39] : memref<808x128xf32, #tpu.memory_space<vmem>>, vector<128x128xf32>
    %c770 = arith.constant 770 : index
    %c0_40 = arith.constant 0 : index
    %96 = vector.load %arg2[%c770, %c0_40] : memref<808x128xf32, #tpu.memory_space<vmem>>, vector<1x128xf32>
    %cst_41 = arith.constant dense<0.000000e+00> : vector<32x128xf32>
    %97 = tpu.matmul %94, %95, %cst_41 {dimension_numbers = #tpu.dot_dimension_numbers<[1], [0], [0], [1], [0, 0, 1, 1], [], []>} : vector<32x128xf32>, vector<128x128xf32>, vector<32x128xf32> -> vector<32x128xf32>
    %98 = vector.broadcast %96 : vector<1x128xf32> to vector<32x128xf32>
    %99 = arith.addf %97, %98 : vector<32x128xf32>
    %c0_42 = arith.constant 0 : index
    %c0_43 = arith.constant 0 : index
    %c0_44 = arith.constant 0 : index
    %100 = vector.load %arg1[%c0_42, %c0_43, %c0_44] : memref<2x16x16xf32, #tpu.memory_space<vmem>>, vector<1x16x16xf32>
    %101 = vector.shape_cast %100 : vector<1x16x16xf32> to vector<16x16xf32>
    %102 = vector.extract_strided_slice %99 {offsets = [0, 0], sizes = [16, 128], strides = [1, 1]} : vector<32x128xf32> to vector<16x128xf32>
    %cst_45 = arith.constant dense<0.000000e+00> : vector<16x128xf32>
    %103 = tpu.matmul %101, %102, %cst_45 {dimension_numbers = #tpu.dot_dimension_numbers<[1], [0], [0], [1], [0, 0, 1, 1], [], []>} : vector<16x16xf32>, vector<16x128xf32>, vector<16x128xf32> -> vector<16x128xf32>
    %c1_46 = arith.constant 1 : index
    %c0_47 = arith.constant 0 : index
    %c0_48 = arith.constant 0 : index
    %104 = vector.load %arg1[%c1_46, %c0_47, %c0_48] : memref<2x16x16xf32, #tpu.memory_space<vmem>>, vector<1x16x16xf32>
    %105 = vector.shape_cast %104 : vector<1x16x16xf32> to vector<16x16xf32>
    %106 = vector.extract_strided_slice %99 {offsets = [16, 0], sizes = [16, 128], strides = [1, 1]} : vector<32x128xf32> to vector<16x128xf32>
    %cst_49 = arith.constant dense<0.000000e+00> : vector<16x128xf32>
    %107 = tpu.matmul %105, %106, %cst_49 {dimension_numbers = #tpu.dot_dimension_numbers<[1], [0], [0], [1], [0, 0, 1, 1], [], []>} : vector<16x16xf32>, vector<16x128xf32>, vector<16x128xf32> -> vector<16x128xf32>
    %108 = tpu.concatenate %103, %107 in 0 : vector<16x128xf32>, vector<16x128xf32> -> vector<32x128xf32>
    %cst_50 = arith.constant dense<0.000000e+00> : vector<32xf32>
    %109 = vector.multi_reduction <add>, %108, %cst_50 [1] : vector<32x128xf32> to vector<32xf32>
    %110 = vector.shape_cast %109 : vector<32xf32> to vector<32x1xf32>
    %111 = arith.mulf %108, %108 : vector<32x128xf32>
    %cst_51 = arith.constant dense<0.000000e+00> : vector<32xf32>
    %112 = vector.multi_reduction <add>, %111, %cst_51 [1] : vector<32x128xf32> to vector<32xf32>
    %113 = vector.shape_cast %112 : vector<32xf32> to vector<32x1xf32>
    %114 = vector.extract_strided_slice %110 {offsets = [0, 0], sizes = [16, 1], strides = [1, 1]} : vector<32x1xf32> to vector<16x1xf32>
    %115 = vector.extract_strided_slice %113 {offsets = [0, 0], sizes = [16, 1], strides = [1, 1]} : vector<32x1xf32> to vector<16x1xf32>
    %116 = vector.extract_strided_slice %110 {offsets = [16, 0], sizes = [16, 1], strides = [1, 1]} : vector<32x1xf32> to vector<16x1xf32>
    %117 = arith.addf %114, %116 : vector<16x1xf32>
    %118 = vector.extract_strided_slice %113 {offsets = [16, 0], sizes = [16, 1], strides = [1, 1]} : vector<32x1xf32> to vector<16x1xf32>
    %119 = arith.addf %115, %118 : vector<16x1xf32>
    %cst_52 = arith.constant 3.125000e-02 : f32
    %120 = vector.broadcast %cst_52 : f32 to vector<16x1xf32>
    %121 = arith.mulf %117, %120 : vector<16x1xf32>
    %cst_53 = arith.constant 3.125000e-02 : f32
    %122 = vector.broadcast %cst_53 : f32 to vector<16x1xf32>
    %123 = arith.mulf %119, %122 : vector<16x1xf32>
    %124 = arith.mulf %121, %121 : vector<16x1xf32>
    %125 = arith.subf %123, %124 : vector<16x1xf32>
    %cst_54 = arith.constant 9.99999974E-6 : f32
    %126 = vector.broadcast %cst_54 : f32 to vector<16x1xf32>
    %127 = arith.addf %125, %126 : vector<16x1xf32>
    %128 = math.rsqrt %127 : vector<16x1xf32>
    %129 = tpu.concatenate %121, %121 in 0 : vector<16x1xf32>, vector<16x1xf32> -> vector<32x1xf32>
    %130 = tpu.concatenate %128, %128 in 0 : vector<16x1xf32>, vector<16x1xf32> -> vector<32x1xf32>
    %c776_55 = arith.constant 776 : index
    %c4 = arith.constant 4 : index
    %131 = vector.load %arg2[%c776_55, %c4] : memref<808x128xf32, #tpu.memory_space<vmem>>, vector<32x1xf32>
    %c776_56 = arith.constant 776 : index
    %c5 = arith.constant 5 : index
    %132 = vector.load %arg2[%c776_56, %c5] : memref<808x128xf32, #tpu.memory_space<vmem>>, vector<32x1xf32>
    %133 = vector.broadcast %129 : vector<32x1xf32> to vector<32x128xf32>
    %134 = arith.subf %108, %133 : vector<32x128xf32>
    %135 = arith.mulf %131, %130 : vector<32x1xf32>
    %136 = vector.broadcast %135 : vector<32x1xf32> to vector<32x128xf32>
    %137 = arith.mulf %134, %136 : vector<32x128xf32>
    %138 = vector.broadcast %132 : vector<32x1xf32> to vector<32x128xf32>
    %139 = arith.addf %137, %138 : vector<32x128xf32>
    %c384 = arith.constant 384 : index
    %c0_57 = arith.constant 0 : index
    %140 = vector.load %arg2[%c384, %c0_57] : memref<808x128xf32, #tpu.memory_space<vmem>>, vector<128x128xf32>
    %cst_58 = arith.constant dense<0.000000e+00> : vector<32x128xf32>
    %141 = tpu.matmul %0, %140, %cst_58 {dimension_numbers = #tpu.dot_dimension_numbers<[1], [0], [0], [1], [0, 0, 1, 1], [], []>} : vector<32x128xf32>, vector<128x128xf32>, vector<32x128xf32> -> vector<32x128xf32>
    %c512 = arith.constant 512 : index
    %c0_59 = arith.constant 0 : index
    %142 = vector.load %arg2[%c512, %c0_59] : memref<808x128xf32, #tpu.memory_space<vmem>>, vector<256x128xf32>
    %c771 = arith.constant 771 : index
    %c0_60 = arith.constant 0 : index
    %143 = vector.load %arg2[%c771, %c0_60] : memref<808x128xf32, #tpu.memory_space<vmem>>, vector<1x128xf32>
    %144 = tpu.concatenate %141, %139 in 1 : vector<32x128xf32>, vector<32x128xf32> -> vector<32x256xf32>
    %cst_61 = arith.constant dense<0.000000e+00> : vector<32x128xf32>
    %145 = tpu.matmul %144, %142, %cst_61 {dimension_numbers = #tpu.dot_dimension_numbers<[1], [0], [0], [1], [0, 0, 1, 1], [], []>} : vector<32x256xf32>, vector<256x128xf32>, vector<32x128xf32> -> vector<32x128xf32>
    %146 = vector.broadcast %143 : vector<1x128xf32> to vector<32x128xf32>
    %147 = arith.addf %145, %146 : vector<32x128xf32>
    %148 = arith.negf %147 : vector<32x128xf32>
    %149 = math.exp %148 : vector<32x128xf32>
    %cst_62 = arith.constant 1.000000e+00 : f32
    %150 = vector.broadcast %cst_62 : f32 to vector<32x128xf32>
    %151 = arith.addf %150, %149 : vector<32x128xf32>
    %152 = arith.divf %150, %151 : vector<32x128xf32>
    %153 = arith.mulf %152, %139 : vector<32x128xf32>
    %cst_63 = arith.constant 1.000000e+00 : f32
    %154 = vector.broadcast %cst_63 : f32 to vector<32x128xf32>
    %155 = arith.subf %154, %152 : vector<32x128xf32>
    %156 = arith.mulf %155, %141 : vector<32x128xf32>
    %157 = arith.addf %153, %156 : vector<32x128xf32>
    %cst_64 = arith.constant 0.000000e+00 : f32
    %158 = vector.broadcast %cst_64 : f32 to vector<32x128xf32>
    %159 = arith.maximumf %157, %158 : vector<32x128xf32>
    %c0_65 = arith.constant 0 : index
    %c0_66 = arith.constant 0 : index
    %160 = vector.load %arg3[%c0_65, %c0_66] : memref<32x128xf32, #tpu.memory_space<vmem>>, vector<32x128xf32>
    tpu.vector_store %arg3[%c0_65, %c0_66], %159 {strides = array<i32>} : memref<32x128xf32, #tpu.memory_space<vmem>>, vector<32x128xf32>,
    return
  }
}

</mosaic_0001>

<bundles_post_ra>
// kernel: tpu_custom_call.1
= control target key start
LH: loop header
LB: loop body
LE: loop exit
PB: predicated region body
PF: predicated region fallthrough
CT: control target
= control target key end

     0   :  { %8 = vsyncpa [#allocation3], 0  ;;  %s2450_s0 = inlined_call_operand.hbm [shape: f32[32,128], index: 0, kind: input, shape index: {}]   ;;  %s2451_s1 = inlined_call_operand.hbm [shape: f32[2,16,16], index: 1, kind: input, shape index: {}]   ;;  %s2452_s2 = inlined_call_operand.hbm [shape: f32[808,128], index: 2, kind: input, shape index: {}]   ;;  %s2453_s3 = inlined_call_operand.hbm [shape: f32[32,128], index: 3, kind: output, shape index: {}]  }
   0x1   :  { %9 = vsyncpa [#allocation6], 0 }
   0x2   :  { %10 = vsyncpa [#allocation4], 0  ;;  %s2164_s12 = smov [#allocation5]   ;;  %s2165_s14 = smov [#allocation2]  }
   0x3   :  { %s28_s13 = sshll.u32 %s2164_s12, 4  ;;  %s16_s15 = sshll.u32 %s2165_s14, 4  ;;  %s29_s13 = int_to_ptr.vmem [resolvable:$true] %s28_s13  ;;  %s2198_s15 = int_to_ptr.vmem [resolvable:$true] %s16_s15 }
   0x4   :  { %s2070_s18 = scalar_lea.hbm %s2451_s1, 512 }
   0x5   :  { %p2071_p0 = scmp.ne.s32.totalorder %s2451_s1, %s2070_s18  ;;  %p2074_p1 = scmp.lt.u32.totalorder %s2070_s18, %s2451_s1 }
   0x7   :  { %p2076_p2 = pnand %p2074_p1, %p2071_p0 }
   0x9   :  { %2079 = shalt.err (!%p2076_p2)
}
   0xa   :  { %s2080_s23 = scalar_lea.vmem %s29_s13, 512  ;;  %p2085_p4 = scmp.lt.s32.totalorder %s29_s13, %s29_s13 }
   0xb   :  { %p2081_p3 = scmp.ne.s32.totalorder %s29_s13, %s2080_s23  ;;  %p2086_p5 = scmp.lt.s32.totalorder %s2080_s23, %s2080_s23 }
   0xd   :  { %p2087_p6 = por %p2086_p5, %p2085_p4 }
   0xf   :  { %p2088_p7 = pnand %p2087_p6, %p2081_p3 }
  0x11   :  { %2091 = shalt.err (!%p2088_p7)
}
  0x12   :  { %s2166_s24 = smov 128   ;;  %s2167_s25 = smov 8  }
  0x13   :  { %34 = dma.hbm_to_vmem [thread:$0]  %s2451_s1, 512, %s29_s13, [#allocation6], %s2166_s24, %s2166_s24, %s2167_s25  }
  0x14   :  { %s2092_s30 = scalar_lea.hbm %s2450_s0, 512 }
  0x15   :  { %p2093_p8 = scmp.ne.s32.totalorder %s2450_s0, %s2092_s30  ;;  %p2096_p9 = scmp.lt.u32.totalorder %s2092_s30, %s2450_s0 }
  0x17   :  { %p2098_p10 = pnand %p2096_p9, %p2093_p8 }
  0x19   :  { %2101 = shalt.err (!%p2098_p10)
}
  0x1a   :  { %s2102_s8 = scalar_lea.vmem %s2198_s15, 512  ;;  %p2107_p12 = scmp.lt.s32.totalorder %s2198_s15, %s2198_s15 }
  0x1b   :  { %p2103_p11 = scmp.ne.s32.totalorder %s2198_s15, %s2102_s8  ;;  %p2108_p13 = scmp.lt.s32.totalorder %s2102_s8, %s2102_s8 }
  0x1d   :  { %p2109_p0 = por %p2108_p13, %p2107_p12 }
  0x1f   :  { %p2110_p1 = pnand %p2109_p0, %p2103_p11 }
  0x21   :  { %2113 = shalt.err (!%p2110_p1)
}
  0x22   :  { %22 = dma.hbm_to_vmem [thread:$0]  %s2450_s0, 512, %s2198_s15, [#allocation3], %s2166_s24, %s2166_s24, %s2167_s25  }
  0x23   :  { %s2168_s10 = smov [#allocation7]   ;;  %s2114_s14 = scalar_lea.hbm %s2452_s2, 12928 }
  0x24   :  { %s40_s11 = sshll.u32 %s2168_s10, 4  ;;  %p2115_p2 = scmp.ne.s32.totalorder %s2452_s2, %s2114_s14  ;;  %s41_s11 = int_to_ptr.vmem [resolvable:$true] %s40_s11 }
  0x25   :  { %p2118_p3 = scmp.lt.u32.totalorder %s2114_s14, %s2452_s2 }
  0x27   :  { %p2120_p4 = pnand %p2118_p3, %p2115_p2 }
  0x29   :  { %2123 = shalt.err (!%p2120_p4)
}
  0x2a   :  { %s2124_s20 = scalar_lea.vmem %s41_s11, 12928  ;;  %p2129_p6 = scmp.lt.s32.totalorder %s41_s11, %s41_s11 }
  0x2b   :  { %p2125_p5 = scmp.ne.s32.totalorder %s41_s11, %s2124_s20  ;;  %p2130_p7 = scmp.lt.s32.totalorder %s2124_s20, %s2124_s20 }
  0x2d   :  { %p2131_p8 = por %p2130_p7, %p2129_p6 }
  0x2f   :  { %p2132_p9 = pnand %p2131_p8, %p2125_p5 }
  0x31   :  { %2135 = shalt.err (!%p2132_p9)
}
  0x32   :  { %46 = dma.hbm_to_vmem [thread:$0]  %s2452_s2, 12928, %s41_s11, [#allocation6], %s2166_s24, %s2166_s24, %s2167_s25  }
  0x33   :  { %2158 = dma.done.wait [#allocation3], 512  }
  0x34   :  { %2159 = vsyncadd [#allocation3], 4294966784 }
  0x35   :  { %2160 = dma.done.wait [#allocation6], 13440  }
  0x36   :  { %2161 = vsyncadd [#allocation6], 4294953856  ;;  %v60_v0 = vld [vmem:[#allocation7] sm:$0xff]  ;;  %v61_v1 = vld [vmem:[#allocation7 + $0x8] sm:$0xff]  ;;  %vm168_vm0 = vcmask 130048   ;;  %v2169_v51 = vmov 0  }
  0x37   :  { %v62_v2 = vld [vmem:[#allocation7 + $0x10] sm:$0xff]  ;;  %v1823_v3 = vpack.c.bf16 %v61_v1, %v60_v0  ;;  %v63_v4 = vld [vmem:[#allocation7 + $0x18] sm:$0xff]  ;;  %v64_v6 = vld [vmem:[#allocation7 + $0x20] sm:$0xff]  ;;  %2022 = vset.pattern.permute.xlu1 %v2169_v51  ;;  %2021 = vset.pattern.permute.xlu0 %v2169_v51  ;;  %v2170_v1 = vmov 1   ;;  %s2172_s2 = smov 2   ;;  %s2174_s21 = smov 4  }
  0x38   :  { %v1827_v5 = vpack.c.bf16 %v63_v4, %v62_v2  ;;  %v65_v7 = vld [vmem:[#allocation7 + $0x28] sm:$0xff]  ;;  %v2250_v9 = vld [vmem:[#allocation2] sm:$0xff]  ;;  %v66_v10 = vld [vmem:[#allocation7 + $0x30] sm:$0xff]  ;;  %s2177_s22 = smov [#allocation8]  }
  0x39   :  { %1824 = vmatprep.subr.bf16.mxu0 %v1823_v3  ;;  %v1831_v8 = vpack.c.bf16 %v65_v7, %v64_v6  ;;  %v67_v11 = vld [vmem:[#allocation7 + $0x38] sm:$0xff]  ;;  %1661 = vmatprep.mubr.f32.mxu0 %v2250_v9  ;;  %v68_v13 = vld [vmem:[#allocation7 + $0x40] sm:$0xff]  ;;  %v69_v14 = vld [vmem:[#allocation7 + $0x48] sm:$0xff]  ;;  %s1448_s23 = sshll.u32 %s2177_s22, 4  ;;  %s1449_s23 = int_to_ptr.vmem [resolvable:$true] %s1448_s23 }
  0x3a   :  { %1826 = vmatpush3.bf16.msra.mxu0 %v1823_v3  ;;  %v1835_v12 = vpack.c.bf16 %v67_v11, %v66_v10  ;;  %v1839_v15 = vpack.c.bf16 %v69_v14, %v68_v13  ;;  %v70_v16 = vld [vmem:[#allocation7 + $0x50] sm:$0xff]  ;;  %v71_v17 = vld [vmem:[#allocation7 + $0x58] sm:$0xff]  ;;  %v72_v19 = vld [vmem:[#allocation7 + $0x60] sm:$0xff]  ;;  %s2136_s26 = scalar_lea.vmem %s1449_s23, 512  ;;  %p2141_p11 = scmp.lt.s32.totalorder %s1449_s23, %s1449_s23 }
  0x3b   :  { %1828 = vmatprep.subr.bf16.mxu0 %v1827_v5  ;;  %v1843_v18 = vpack.c.bf16 %v71_v17, %v70_v16  ;;  %v73_v20 = vld [vmem:[#allocation7 + $0x68] sm:$0xff]  ;;  %v74_v22 = vld [vmem:[#allocation7 + $0x70] sm:$0xff]  ;;  %v75_v23 = vld [vmem:[#allocation7 + $0x78] sm:$0xff]  ;;  %p2137_p10 = scmp.ne.s32.totalorder %s1449_s23, %s2136_s26  ;;  %p2142_p12 = scmp.lt.s32.totalorder %s2136_s26, %s2136_s26 }
  0x3c   :  { %v1847_v21 = vpack.c.bf16 %v73_v20, %v72_v19  ;;  %v1851_v24 = vpack.c.bf16 %v75_v23, %v74_v22  ;;  %v2253_v25 = vld [vmem:[#allocation2 + $0x8] sm:$0xff]  ;;  %v2255_v26 = vld [vmem:[#allocation2 + $0x10] sm:$0xff]  ;;  %v2259_v27 = vld [vmem:[#allocation2 + $0x18] sm:$0xff] }
  0x3d   :  { %v2262_v28 = vld [vmem:[#allocation5] sm:$0xff]  ;;  %v2266_v39 = vld [vmem:[#allocation5 + $0x8] sm:$0xff]  ;;  %v2268_v41 = vld [vmem:[#allocation5 + $0x10] sm:$0xff]  ;;  %p2143_p13 = por %p2142_p12, %p2141_p11 }
  0x3e   :  { %1830 = vmatpush3.bf16.msra.mxu0 %v1827_v5  ;;  %v1461_v29 = vld [vmem:[#allocation7 + $0x300] ss:$0 sm:$0xff]  ;;  %v2274_v42 = vld [vmem:[#allocation5 + $0x18] sm:$0xff]  ;;  %v2302_v61 = vld [vmem:[#allocation7 + $0x308] sm:$0xff] }
  0x3f   :  { %1832 = vmatprep.subr.bf16.mxu0 %v1831_v8  ;;  %v444_v4 = vld [vmem:[#allocation7 + $0x80] sm:$0xff]  ;;  %v445_v5 = vld [vmem:[#allocation7 + $0x88] sm:$0xff]  ;;  %v446_v6 = vld [vmem:[#allocation7 + $0x90] sm:$0xff]  ;;  %p2144_p0 = pnand %p2143_p13, %p2137_p10 }
  0x40   :  { %v2306_v7 = vld [vmem:[#allocation7 + $0x310] sm:$0xff]  ;;  %v447_v10 = vld [vmem:[#allocation7 + $0x98] sm:$0xff]  ;;  %v449_v16 = vld [vmem:[#allocation7 + $0xa8] sm:$0xff] }
  0x41   :  { %v1867_v14 = vpack.c.bf16 %v447_v10, %v446_v6  ;;  %v2309_v19 = vld [vmem:[#allocation7 + $0x320] sm:$0xff]  ;;  %v450_v23 = vld [vmem:[#allocation7 + $0xb0] sm:$0xff] }
  0x42   :  { %1834 = vmatpush3.bf16.msra.mxu0 %v1831_v8  ;;  %v1863_v8 = vpack.c.bf16 %v445_v5, %v444_v4 }
  0x43   :  { %1836 = vmatprep.subr.bf16.mxu0 %v1835_v12 }
  0x44   :  { %1864 = vmatprep.subr.bf16.mxu1 %v1863_v8 }
  0x45   :  { %1866 = vmatpush3.bf16.msra.mxu1 %v1863_v8 }
  0x46   :  { %1838 = vmatpush3.bf16.msra.mxu0 %v1835_v12  ;;  %1868 = vmatprep.subr.bf16.mxu1 %v1867_v14 }
  0x47   :  { %1840 = vmatprep.subr.bf16.mxu0 %v1839_v15 }
  0x49   :  { %1870 = vmatpush3.bf16.msra.mxu1 %v1867_v14 }
  0x4a   :  { %1842 = vmatpush3.bf16.msra.mxu0 %v1839_v15  ;;  %v448_v15 = vld [vmem:[#allocation7 + $0xa0] sm:$0xff] }
  0x4b   :  { %1844 = vmatprep.subr.bf16.mxu0 %v1843_v18  ;;  %v1871_v22 = vpack.c.bf16 %v449_v16, %v448_v15 }
  0x4d   :  { %1872 = vmatprep.subr.bf16.mxu1 %v1871_v22 }
  0x4e   :  { %1846 = vmatpush3.bf16.msra.mxu0 %v1843_v18  ;;  %1874 = vmatpush3.bf16.msra.mxu1 %v1871_v22  ;;  %v1466_v22 = vld [vmem:[#allocation7 + $0x301] ss:$0 sm:$0xff] }
  0x4f   :  { %1848 = vmatprep.subr.bf16.mxu0 %v1847_v21 }
  0x52   :  { %1850 = vmatpush3.bf16.msra.mxu0 %v1847_v21 }
  0x53   :  { %1852 = vmatprep.subr.bf16.mxu0 %v1851_v24 }
  0x56   :  { %1854 = vmatpush3.bf16.msra.mxu0 %v1851_v24  ;;  %v451_v24 = vld [vmem:[#allocation7 + $0xb8] sm:$0xff] }
  0x59   :  { %1662 = vmatmul.mubr.f32.vlgmr.msra.gmra.mrb[0].mxu0 %v2253_v25 }
  0x5a   :  { %1664 = vmatprep.mubr.f32.mxu0 %v2255_v26 }
  0x5d   :  { %1665 = vmatmul.mubr.f32.gmra.mrb[2].mxu0 %v2259_v27 }
  0x5e   :  { %1671 = vmatprep.mubr.msk.f32.mxu0 %vm168_vm0, %v2262_v28 }
 0x12c   :  { %v1663_v30 = vpop.f32.mrb[0].mxu0 }
 0x12d   :  { %v153_v31 = vadd.f32 %v1663_v30, %v1461_v29  ;;  %v147_v32 = vpop.f32.mrb[1].mxu0  ;;  %v1875_v30 = vpack.c.bf16 %v451_v24, %v450_v23 }
 0x12e   :  { %v148_v33 = vadd.f32 %v1461_v29, %v147_v32  ;;  %v453_v32 = vld [vmem:[#allocation7 + $0xc8] sm:$0xff] }
 0x12f   :  { %1876 = vmatprep.subr.bf16.mxu1 %v1875_v30 }
 0x130   :  { %v1855_v34 = vpack.c.bf16 %v153_v31, %v148_v33  ;;  %v1666_v35 = vpop.f32.mrb[2].mxu0  ;;  %v452_v31 = vld [vmem:[#allocation7 + $0xc0] sm:$0xff]  ;;  %1878 = vmatpush3.bf16.msra.mxu1 %v1875_v30 }
 0x131   :  { %v163_v36 = vadd.f32 %v1666_v35, %v1461_v29  ;;  %v157_v37 = vpop.f32.mrb[3].mxu0  ;;  %v1879_v33 = vpack.c.bf16 %v453_v32, %v452_v31 }
 0x132   :  { %v158_v38 = vadd.f32 %v1461_v29, %v157_v37  ;;  %1856 = vmatprep.subr.bf16.mxu0 %v1855_v34  ;;  %v455_v37 = vld [vmem:[#allocation7 + $0xd8] sm:$0xff] }
 0x133   :  { %1858 = vmatpush3.bf16.msra.mxu0 %v1855_v34  ;;  %1880 = vmatprep.subr.bf16.mxu1 %v1879_v33 }
 0x134   :  { %v1859_v40 = vpack.c.bf16 %v163_v36, %v158_v38  ;;  %1882 = vmatpush3.bf16.msra.mxu1 %v1879_v33  ;;  %v454_v36 = vld [vmem:[#allocation7 + $0xd0] sm:$0xff] }
 0x135   :  { %v1883_v38 = vpack.c.bf16 %v455_v37, %v454_v36 }
 0x136   :  { %1672 = vmatmul.mubr.msk.f32.vlgmr.msra.gmra.mrb[4].mxu0 %vm168_vm0, %v2266_v39  ;;  %1860 = vmatprep.subr.bf16.mxu0 %v1859_v40 }
 0x137   :  { %1862 = vmatpush3.bf16.msra.mxu0 %v1859_v40  ;;  %1678 = vmatprep.mubr.msk.f32.mxu0 %vm168_vm0, %v2268_v41 }
 0x138   :  { %1884 = vmatprep.subr.bf16.mxu1 %v1883_v38 }
 0x139   :  { %1886 = vmatpush3.bf16.msra.mxu1 %v1883_v38 }
 0x13a   :  { %1679 = vmatmul.mubr.msk.f32.vlgmr.msra.gmra.mrb[6].mxu0 %vm168_vm0, %v2274_v42 }
 0x13b   :  { %1723 = vmatprep.mubr.msk.f32.mxu0 %vm168_vm0, %v2262_v28 }
 0x209   :  { %v2280_v43 = vpop.f32.mrb[4].mxu0 }
 0x20a   :  { %336 = vadd.xlane.f32.xlu1 %v2280_v43  ;;  %v2283_v44 = vpop.f32.mrb[5].mxu0  ;;  %v343_v50 = vmul.f32 %v2280_v43, %v2280_v43 }
 0x20b   :  { %334 = vadd.xlane.f32.xlu0 %v2283_v44  ;;  %v342_v46 = vmul.f32 %v2283_v44, %v2283_v44 }
 0x20d   :  { %v2286_v45 = vpop.f32.mrb[6].mxu0 }
 0x20e   :  { %340 = vadd.xlane.f32.xlu1 %v2286_v45  ;;  %v2291_v47 = vpop.f32.mrb[7].mxu0  ;;  %v345_v49 = vmul.f32 %v2286_v45, %v2286_v45 }
 0x20f   :  { %346 = vadd.xlane.f32.xlu0 %v342_v46  ;;  %v344_v48 = vmul.f32 %v2291_v47, %v2291_v47 }
 0x212   :  { %350 = vadd.xlane.f32.xlu1 %v344_v48  ;;  %v456_v48 = vld [vmem:[#allocation7 + $0xe0] sm:$0xff] }
 0x213   :  { %338 = vadd.xlane.f32.xlu0 %v2291_v47 }
 0x216   :  { %352 = vadd.xlane.f32.xlu1 %v345_v49  ;;  %v457_v49 = vld [vmem:[#allocation7 + $0xe8] sm:$0xff] }
 0x217   :  { %348 = vadd.xlane.f32.xlu0 %v343_v50  ;;  %v1887_v50 = vpack.c.bf16 %v457_v49, %v456_v48  ;;  %v2171_v49 = vmov 3  }
 0x219   :  { %1888 = vmatprep.subr.bf16.mxu1 %v1887_v50 }
 0x21a   :  { %1890 = vmatpush3.bf16.msra.mxu1 %v1887_v50 }
 0x297   :  { %v337_v52 = vpop.xlane.xlu1 %336 }
 0x298   :  { %v335_v53 = vpop.xlane.xlu0 %334 }
 0x29b   :  { %v341_v54 = vpop.xlane.xlu1 %340 }
 0x29c   :  { %v355_v55 = vadd.f32 %v341_v54, %v337_v52  ;;  %v347_v56 = vpop.xlane.xlu0 %346  ;;  %v458_v54 = vld [vmem:[#allocation7 + $0xf0] sm:$0xff] }
 0x29e   :  { %v359_v57 = vmul.f32 0.015625, %v355_v55  ;;  %v459_v55 = vld [vmem:[#allocation7 + $0xf8] sm:$0xff] }
 0x29f   :  { %v351_v58 = vpop.xlane.xlu1 %350 }
 0x2a0   :  { %v339_v59 = vpop.xlane.xlu0 %338  ;;  %381 = vperm.xlu1 %2022, %v359_v57   ;;  %v356_v2 = vadd.f32 %v351_v58, %v347_v56  ;;  %v363_v11 = vmul.f32 %v359_v57, %v359_v57  ;;  %v1891_v56 = vpack.c.bf16 %v459_v55, %v458_v54 }
 0x2a1   :  { %v354_v60 = vadd.f32 %v339_v59, %v335_v53  ;;  %v2317_v53 = vld [vmem:[#allocation7 + $0x318] sm:$0xff] }
 0x2a2   :  { %v360_v17 = vmul.f32 0.015625, %v356_v2  ;;  %1892 = vmatprep.subr.bf16.mxu1 %v1891_v56 }
 0x2a3   :  { %v358_v62 = vmul.f32 0.015625, %v354_v60  ;;  %v353_v63 = vpop.xlane.xlu1 %352  ;;  %1894 = vmatpush3.bf16.msra.mxu1 %v1891_v56 }
 0x2a4   :  { %v349_v0 = vpop.xlane.xlu0 %348  ;;  %2023 = vset.pattern.permute.xlu1 %v2170_v1 }
 0x2a5   :  { %v357_v3 = vadd.f32 %v353_v63, %v349_v0  ;;  %376 = vperm.xlu0 %2021, %v358_v62   ;;  %418 = vperm.xlu1 %2023, %v2302_v61   ;;  %v362_v12 = vmul.f32 %v358_v62, %v358_v62 }
 0x2a7   :  { %v361_v13 = vmul.f32 0.015625, %v357_v3  ;;  %v364_v20 = vsub.f32 %v360_v17, %v362_v12 }
 0x2a9   :  { %v365_v18 = vsub.f32 %v361_v13, %v363_v11  ;;  %423 = vperm.xlu1 %2023, %v2306_v7   ;;  %2026 = vset.pattern.permute.xlu0 %v2170_v1  ;;  %v366_v29 = vadd.f32 1e-05, %v364_v20 }
 0x2aa   :  { %433 = vperm.xlu0 %2026, %v2309_v19  }
 0x2ab   :  { %v367_v21 = vadd.f32 1e-05, %v365_v18 }
 0x2ad   :  { %2042 = vrsqrt.f32 %v367_v21  ;;  %2024 = vset.pattern.permute.xlu1 %v2169_v51 }
 0x2ae   :  { %2044 = vrsqrt.f32 %v366_v29  ;;  %2029 = vset.pattern.permute.xlu0 %v2171_v49 }
 0x2b7   :  { %v2043_v34 = vpop.eup %2042 }
 0x2b8   :  { %v389_v35 = vmul.f32 %v2043_v34, %v2306_v7  ;;  %v391_v40 = vmul.f32 %v2043_v34, %v2309_v19  ;;  %v2045_v46 = vpop.eup %2044 }
 0x2b9   :  { %v388_v52 = vmul.f32 %v2045_v46, %v2302_v61  ;;  %v390_v57 = vmul.f32 %v2045_v46, %v2317_v53 }
 0x2ba   :  { %399 = vperm.xlu1 %2024, %v389_v35  }
 0x2be   :  { %409 = vperm.xlu1 %2024, %v391_v40  }
 0x2c2   :  { %394 = vperm.xlu1 %2024, %v388_v52  }
 0x2c6   :  { %404 = vperm.xlu1 %2024, %v390_v57  }
 0x2ca   :  { %2025 = vset.pattern.permute.xlu1 %v2170_v1 }
 0x2cb   :  { %428 = vperm.xlu1 %2025, %v2317_v53  }
 0x2cf   :  { %2027 = vset.pattern.permute.xlu1 %v2169_v51 }
 0x31f   :  { %v382_v58 = vpop.permute.xlu1 %381 }
 0x320   :  { %v385_v63 = vsub.f32 %v2280_v43, %v382_v58  ;;  %v387_v1 = vsub.f32 %v2286_v45, %v382_v58 }
 0x324   :  { %v419_v59 = vpop.permute.xlu1 %418  ;;  %v377_v0 = vpop.permute.xlu0 %376 }
 0x325   :  { %v384_v4 = vsub.f32 %v2283_v44, %v377_v0  ;;  %v386_v14 = vsub.f32 %v2291_v47, %v377_v0 }
 0x328   :  { %v424_v60 = vpop.permute.xlu1 %423 }
 0x329   :  { %v434_v16 = vpop.permute.xlu0 %433 }
 0x339   :  { %v400_v62 = vpop.permute.xlu1 %399 }
 0x33a   :  { %v413_v3 = vmul.f32 %v400_v62, %v385_v63 }
 0x33c   :  { %v437_v8 = vadd.f32 %v424_v60, %v413_v3 }
 0x33d   :  { %v410_v2 = vpop.permute.xlu1 %409 }
 0x33e   :  { %v415_v12 = vmul.f32 %v410_v2, %v387_v1  ;;  %v441_v15 = vmax.f32 %v437_v8, 0.0 }
 0x340   :  { %v439_v17 = vadd.f32 %v434_v16, %v415_v12  ;;  %v811_v16 = vld [vmem:[#allocation7 + $0x108] sm:$0xff] }
 0x341   :  { %v395_v5 = vpop.permute.xlu1 %394 }
 0x342   :  { %v412_v6 = vmul.f32 %v395_v5, %v384_v4  ;;  %v443_v21 = vmax.f32 %v439_v17, 0.0 }
 0x344   :  { %v436_v10 = vadd.f32 %v419_v59, %v412_v6 }
 0x345   :  { %v405_v11 = vpop.permute.xlu1 %404 }
 0x346   :  { %v440_v13 = vmax.f32 %v436_v10, 0.0  ;;  %v414_v43 = vmul.f32 %v405_v11, %v386_v14 }
 0x348   :  { %1713 = vmatprep.mubr.f32.mxu1 %v440_v13 }
 0x349   :  { %1714 = vmatmul.mubr.f32.vlgmr.msra.gmra.mrb[0].mxu1 %v441_v15  ;;  %v810_v15 = vld [vmem:[#allocation7 + $0x100] sm:$0xff] }
 0x34a   :  { %v429_v18 = vpop.permute.xlu1 %428  ;;  %v1903_v17 = vpack.c.bf16 %v811_v16, %v810_v15 }
 0x34b   :  { %v438_v20 = vadd.f32 %v429_v18, %v414_v43  ;;  %v812_v43 = vld [vmem:[#allocation7 + $0x110] sm:$0xff]  ;;  %v813_v18 = vld [vmem:[#allocation7 + $0x118] sm:$0xff] }
 0x34c   :  { %1904 = vmatprep.subr.bf16.mxu1 %v1903_v17 }
 0x34d   :  { %v442_v44 = vmax.f32 %v438_v20, 0.0  ;;  %v1907_v20 = vpack.c.bf16 %v813_v18, %v812_v43  ;;  %1906 = vmatpush3.bf16.msra.mxu1 %v1903_v17 }
 0x34f   :  { %1716 = vmatprep.mubr.f32.mxu1 %v442_v44  ;;  %v814_v44 = vld [vmem:[#allocation7 + $0x120] sm:$0xff]  ;;  %1908 = vmatprep.subr.bf16.mxu1 %v1907_v20 }
 0x350   :  { %1717 = vmatmul.mubr.f32.gmra.mrb[2].mxu1 %v443_v21  ;;  %v815_v21 = vld [vmem:[#allocation7 + $0x128] sm:$0xff] }
 0x351   :  { %1910 = vmatpush3.bf16.msra.mxu1 %v1907_v20 }
 0x41c   :  { %v1715_v45 = vpop.f32.mrb[0].mxu1 }
 0x41d   :  { %v537_v23 = vadd.f32 %v1715_v45, %v1466_v22  ;;  %v531_v24 = vpop.f32.mrb[1].mxu1  ;;  %v1911_v45 = vpack.c.bf16 %v815_v21, %v814_v44  ;;  %v1471_v44 = vld [vmem:[#allocation7 + $0x302] ss:$0 sm:$0xff] }
 0x41e   :  { %v532_v29 = vadd.f32 %v1466_v22, %v531_v24  ;;  %v817_v24 = vld [vmem:[#allocation7 + $0x138] sm:$0xff] }
 0x41f   :  { %1912 = vmatprep.subr.bf16.mxu1 %v1911_v45 }
 0x420   :  { %v1895_v30 = vpack.c.bf16 %v537_v23, %v532_v29  ;;  %v816_v23 = vld [vmem:[#allocation7 + $0x130] sm:$0xff]  ;;  %1914 = vmatpush3.bf16.msra.mxu1 %v1911_v45 }
 0x421   :  { %v1915_v29 = vpack.c.bf16 %v817_v24, %v816_v23 }
 0x422   :  { %1896 = vmatprep.subr.bf16.mxu0 %v1895_v30 }
 0x423   :  { %v1718_v47 = vpop.f32.mrb[2].mxu1  ;;  %1898 = vmatpush3.bf16.msra.mxu0 %v1895_v30  ;;  %v818_v30 = vld [vmem:[#allocation7 + $0x140] sm:$0xff]  ;;  %1916 = vmatprep.subr.bf16.mxu1 %v1915_v29 }
 0x424   :  { %v547_v31 = vadd.f32 %v1718_v47, %v1466_v22  ;;  %v541_v32 = vpop.f32.mrb[3].mxu1  ;;  %v819_v47 = vld [vmem:[#allocation7 + $0x148] sm:$0xff]  ;;  %1918 = vmatpush3.bf16.msra.mxu1 %v1915_v29 }
 0x425   :  { %v542_v33 = vadd.f32 %v1466_v22, %v541_v32  ;;  %v2173_v22 = vmov 2   ;;  %v820_v32 = vld [vmem:[#allocation7 + $0x150] sm:$0xff] }
 0x426   :  { %1724 = vmatmul.mubr.msk.f32.vlgmr.msra.gmra.mrb[8].mxu0 %vm168_vm0, %v2266_v39 }
 0x427   :  { %v1899_v34 = vpack.c.bf16 %v547_v31, %v542_v33  ;;  %1730 = vmatprep.mubr.msk.f32.mxu0 %vm168_vm0, %v2268_v41  ;;  %v1919_v31 = vpack.c.bf16 %v819_v47, %v818_v30  ;;  %v821_v33 = vld [vmem:[#allocation7 + $0x158] sm:$0xff] }
 0x429   :  { %1900 = vmatprep.subr.bf16.mxu0 %v1899_v34  ;;  %1920 = vmatprep.subr.bf16.mxu1 %v1919_v31 }
 0x42a   :  { %1902 = vmatpush3.bf16.msra.mxu0 %v1899_v34  ;;  %v1923_v34 = vpack.c.bf16 %v821_v33, %v820_v32  ;;  %1922 = vmatpush3.bf16.msra.mxu1 %v1919_v31 }
 0x42c   :  { %1924 = vmatprep.subr.bf16.mxu1 %v1923_v34 }
 0x42d   :  { %1731 = vmatmul.mubr.msk.f32.vlgmr.msra.gmra.mrb[10].mxu0 %vm168_vm0, %v2274_v42 }
 0x42e   :  { %1775 = vmatprep.mubr.msk.f32.mxu0 %vm168_vm0, %v2262_v28  ;;  %1926 = vmatpush3.bf16.msra.mxu1 %v1923_v34 }
 0x4f9   :  { %v2335_v35 = vpop.f32.mrb[8].mxu0 }
 0x4fa   :  { %702 = vadd.xlane.f32.xlu1 %v2335_v35  ;;  %v2338_v36 = vpop.f32.mrb[9].mxu0  ;;  %v709_v28 = vmul.f32 %v2335_v35, %v2335_v35 }
 0x4fb   :  { %v708_v38 = vmul.f32 %v2338_v36, %v2338_v36 }
 0x4fe   :  { %700 = vadd.xlane.f32.xlu1 %v2338_v36 }
 0x500   :  { %v2341_v37 = vpop.f32.mrb[10].mxu0 }
 0x501   :  { %706 = vadd.xlane.f32.xlu0 %v2341_v37  ;;  %v2346_v40 = vpop.f32.mrb[11].mxu0  ;;  %v711_v48 = vmul.f32 %v2341_v37, %v2341_v37 }
 0x502   :  { %712 = vadd.xlane.f32.xlu1 %v708_v38  ;;  %v710_v46 = vmul.f32 %v2346_v40, %v2346_v40 }
 0x505   :  { %704 = vadd.xlane.f32.xlu0 %v2346_v40 }
 0x506   :  { %714 = vadd.xlane.f32.xlu1 %v709_v28 }
 0x509   :  { %716 = vadd.xlane.f32.xlu0 %v710_v46  ;;  %v822_v46 = vld [vmem:[#allocation7 + $0x160] sm:$0xff] }
 0x50d   :  { %718 = vadd.xlane.f32.xlu0 %v711_v48  ;;  %v823_v48 = vld [vmem:[#allocation7 + $0x168] sm:$0xff] }
 0x587   :  { %v703_v50 = vpop.xlane.xlu1 %702 }
 0x58b   :  { %v701_v52 = vpop.xlane.xlu1 %700 }
 0x58e   :  { %v707_v54 = vpop.xlane.xlu0 %706 }
 0x58f   :  { %v713_v57 = vpop.xlane.xlu1 %712  ;;  %v721_v58 = vadd.f32 %v707_v54, %v703_v50  ;;  %v1927_v50 = vpack.c.bf16 %v823_v48, %v822_v46  ;;  %v1174_v48 = vld [vmem:[#allocation7 + $0x190] sm:$0xff] }
 0x591   :  { %v725_v63 = vmul.f32 0.015625, %v721_v58  ;;  %1928 = vmatprep.subr.bf16.mxu1 %v1927_v50 }
 0x592   :  { %v705_v55 = vpop.xlane.xlu0 %704  ;;  %1930 = vmatpush3.bf16.msra.mxu1 %v1927_v50  ;;  %v1175_v50 = vld [vmem:[#allocation7 + $0x198] sm:$0xff] }
 0x593   :  { %v720_v56 = vadd.f32 %v705_v55, %v701_v52  ;;  %v715_v3 = vpop.xlane.xlu1 %714  ;;  %v729_v8 = vmul.f32 %v725_v63, %v725_v63  ;;  %v824_v55 = vld [vmem:[#allocation7 + $0x170] sm:$0xff] }
 0x595   :  { %v724_v59 = vmul.f32 0.015625, %v720_v56  ;;  %v825_v56 = vld [vmem:[#allocation7 + $0x178] sm:$0xff] }
 0x596   :  { %v717_v60 = vpop.xlane.xlu0 %716 }
 0x597   :  { %v722_v62 = vadd.f32 %v717_v60, %v713_v57  ;;  %v728_v0 = vmul.f32 %v724_v59, %v724_v59  ;;  %v1931_v57 = vpack.c.bf16 %v825_v56, %v824_v55  ;;  %v1177_v55 = vld [vmem:[#allocation7 + $0x1a8] sm:$0xff]  ;;  %v1178_v56 = vld [vmem:[#allocation7 + $0x1b0] sm:$0xff] }
 0x599   :  { %v726_v2 = vmul.f32 0.015625, %v722_v62  ;;  %1932 = vmatprep.subr.bf16.mxu1 %v1931_v57 }
 0x59a   :  { %v719_v4 = vpop.xlane.xlu0 %718  ;;  %1934 = vmatpush3.bf16.msra.mxu1 %v1931_v57 }
 0x59b   :  { %v730_v5 = vsub.f32 %v726_v2, %v728_v0  ;;  %v723_v6 = vadd.f32 %v719_v4, %v715_v3 }
 0x59d   :  { %v732_v1 = vadd.f32 1e-05, %v730_v5  ;;  %v727_v10 = vmul.f32 0.015625, %v723_v6 }
 0x59f   :  { %2046 = vrsqrt.f32 %v732_v1  ;;  %v731_v11 = vsub.f32 %v727_v10, %v729_v8 }
 0x5a1   :  { %v733_v12 = vadd.f32 1e-05, %v731_v11 }
 0x5a3   :  { %2048 = vrsqrt.f32 %v733_v12 }
 0x5a9   :  { %v2047_v13 = vpop.eup %2046 }
 0x5aa   :  { %752 = vrot.lane.b32.xlu1 %v2047_v13, %s2172_s2 }
 0x5ad   :  { %v2049_v14 = vpop.eup %2048 }
 0x5ae   :  { %738 = vperm.xlu1 %2027, %v724_v59   ;;  %754 = vrot.lane.b32.xlu0 %v2049_v14, %s2172_s2 }
 0x5b2   :  { %743 = vperm.xlu1 %2027, %v725_v63   ;;  %791 = vperm.xlu0 %2029, %v2306_v7  }
 0x5b6   :  { %2028 = vset.pattern.permute.xlu1 %v2171_v49  ;;  %2031 = vset.pattern.permute.xlu0 %v2173_v22 }
 0x5b7   :  { %787 = vperm.xlu1 %2028, %v2302_v61  }
 0x5bb   :  { %2030 = vset.pattern.permute.xlu1 %v2173_v22 }
 0x61c   :  { %v753_v38 = vpop.permute.xlu1 %752 }
 0x61d   :  { %v758_v28 = vmul.f32 %v753_v38, %v2302_v61  ;;  %v760_v59 = vmul.f32 %v753_v38, %v2317_v53  ;;  %v1172_v38 = vld [vmem:[#allocation7 + $0x180] sm:$0xff] }
 0x61f   :  { %764 = vperm.xlu0 %2031, %v758_v28   ;;  %v1173_v28 = vld [vmem:[#allocation7 + $0x188] sm:$0xff] }
 0x620   :  { %v755_v52 = vpop.permute.xlu0 %754  ;;  %v1943_v46 = vpack.c.bf16 %v1173_v28, %v1172_v38 }
 0x621   :  { %v759_v54 = vmul.f32 %v755_v52, %v2306_v7  ;;  %v761_v58 = vmul.f32 %v755_v52, %v2309_v19  ;;  %v1947_v52 = vpack.c.bf16 %v1175_v50, %v1174_v48  ;;  %v1276_v48 = vld [vmem:[#allocation7 + $0x218] sm:$0xff]  ;;  %v1293_v50 = vld [vmem:[#allocation7 + $0x2a0] sm:$0xff] }
 0x623   :  { %769 = vperm.xlu1 %2030, %v759_v54   ;;  %2032 = vset.pattern.permute.xlu0 %v2171_v49  ;;  %v1176_v54 = vld [vmem:[#allocation7 + $0x1a0] sm:$0xff] }
 0x624   :  { %795 = vperm.xlu0 %2032, %v2317_v53   ;;  %v1951_v57 = vpack.c.bf16 %v1177_v55, %v1176_v54  ;;  %v2176_v54 = vmov 4  }
 0x627   :  { %779 = vperm.xlu1 %2030, %v761_v58   ;;  %v1179_v58 = vld [vmem:[#allocation7 + $0x1b8] sm:$0xff] }
 0x628   :  { %2035 = vset.pattern.permute.xlu0 %v2169_v51 }
 0x62b   :  { %774 = vperm.xlu1 %2030, %v760_v59   ;;  %v1955_v59 = vpack.c.bf16 %v1179_v58, %v1178_v56  ;;  %v1278_v58 = vld [vmem:[#allocation7 + $0x228] sm:$0xff] }
 0x62d   :  { %v739_v60 = vpop.permute.xlu1 %738 }
 0x62e   :  { %v746_v2 = vsub.f32 %v2338_v36, %v739_v60 }
 0x62f   :  { %2033 = vset.pattern.permute.xlu1 %v2171_v49 }
 0x630   :  { %799 = vperm.xlu1 %2033, %v2309_v19  }
 0x631   :  { %v744_v62 = vpop.permute.xlu1 %743  ;;  %v792_v63 = vpop.permute.xlu0 %791 }
 0x632   :  { %v747_v5 = vsub.f32 %v2335_v35, %v744_v62  ;;  %v749_v36 = vsub.f32 %v2341_v37, %v744_v62  ;;  %v1181_v62 = vld [vmem:[#allocation7 + $0x1c8] sm:$0xff] }
 0x634   :  { %2034 = vset.pattern.permute.xlu1 %v2169_v51  ;;  %v748_v51 = vsub.f32 %v2346_v40, %v739_v60  ;;  %v1180_v60 = vld [vmem:[#allocation7 + $0x1c0] sm:$0xff] }
 0x636   :  { %v788_v0 = vpop.permute.xlu1 %787 }
 0x69e   :  { %v765_v3 = vpop.permute.xlu0 %764 }
 0x69f   :  { %v782_v4 = vmul.f32 %v765_v3, %v746_v2  ;;  %v1183_v2 = vld [vmem:[#allocation7 + $0x1d8] sm:$0xff] }
 0x6a1   :  { %v802_v6 = vadd.f32 %v788_v0, %v782_v4  ;;  %v1182_v0 = vld [vmem:[#allocation7 + $0x1d0] sm:$0xff]  ;;  %v1184_v4 = vld [vmem:[#allocation7 + $0x1e0] sm:$0xff] }
 0x6a2   :  { %v770_v8 = vpop.permute.xlu1 %769  ;;  %v1963_v3 = vpack.c.bf16 %v1183_v2, %v1182_v0  ;;  %v1279_v0 = vld [vmem:[#allocation7 + $0x230] sm:$0xff]  ;;  %v1280_v2 = vld [vmem:[#allocation7 + $0x238] sm:$0xff] }
 0x6a3   :  { %v806_v1 = vmax.f32 %v802_v6, 0.0  ;;  %v783_v10 = vmul.f32 %v770_v8, %v747_v5  ;;  %v796_v14 = vpop.permute.xlu0 %795  ;;  %v1185_v5 = vld [vmem:[#allocation7 + $0x1e8] sm:$0xff]  ;;  %v1186_v8 = vld [vmem:[#allocation7 + $0x1f0] sm:$0xff] }
 0x6a4   :  { %v1967_v6 = vpack.c.bf16 %v1185_v5, %v1184_v4  ;;  %v1298_v4 = vld [vmem:[#allocation7 + $0x2c8] sm:$0xff]  ;;  %v1989_v5 = vpack.c.bf16 %v1280_v2, %v1279_v0 }
 0x6a5   :  { %v803_v11 = vadd.f32 %v792_v63, %v783_v10  ;;  %1765 = vmatprep.mubr.f32.mxu1 %v806_v1  ;;  %v1959_v63 = vpack.c.bf16 %v1181_v62, %v1180_v60  ;;  %v1187_v1 = vld [vmem:[#allocation7 + $0x1f8] sm:$0xff] }
 0x6a6   :  { %v780_v49 = vpop.permute.xlu1 %779  ;;  %v1971_v10 = vpack.c.bf16 %v1187_v1, %v1186_v8  ;;  %v1296_v60 = vld [vmem:[#allocation7 + $0x2b8] sm:$0xff]  ;;  %v1281_v8 = vld [vmem:[#allocation7 + $0x240] sm:$0xff]  ;;  %v1282_v1 = vld [vmem:[#allocation7 + $0x248] sm:$0xff] }
 0x6a7   :  { %v807_v12 = vmax.f32 %v803_v11, 0.0  ;;  %v785_v43 = vmul.f32 %v780_v49, %v749_v36 }
 0x6a9   :  { %1766 = vmatmul.mubr.f32.vlgmr.msra.gmra.mrb[4].mxu1 %v807_v12 }
 0x6aa   :  { %v775_v13 = vpop.permute.xlu1 %774 }
 0x6ab   :  { %v784_v15 = vmul.f32 %v775_v13, %v748_v51 }
 0x6ad   :  { %v804_v16 = vadd.f32 %v796_v14, %v784_v15 }
 0x6af   :  { %v808_v17 = vmax.f32 %v804_v16, 0.0  ;;  %v800_v35 = vpop.permute.xlu1 %799 }
 0x6b0   :  { %v805_v18 = vadd.f32 %v800_v35, %v785_v43 }
 0x6b1   :  { %1768 = vmatprep.mubr.f32.mxu1 %v808_v17 }
 0x6b2   :  { %v809_v20 = vmax.f32 %v805_v18, 0.0 }
 0x6b4   :  { %1769 = vmatmul.mubr.f32.gmra.mrb[6].mxu1 %v809_v20 }
 0x77c   :  { %v1767_v21 = vpop.f32.mrb[4].mxu1 }
 0x77d   :  { %v903_v22 = vadd.f32 %v1767_v21, %v1471_v44  ;;  %v897_v45 = vpop.f32.mrb[5].mxu1 }
 0x77e   :  { %v898_v23 = vadd.f32 %v1471_v44, %v897_v45 }
 0x780   :  { %v1935_v40 = vpack.c.bf16 %v903_v22, %v898_v23 }
 0x782   :  { %1936 = vmatprep.subr.bf16.mxu0 %v1935_v40 }
 0x783   :  { %1938 = vmatpush3.bf16.msra.mxu0 %v1935_v40 }
 0x786   :  { %1776 = vmatmul.mubr.msk.f32.vlgmr.msra.gmra.mrb[12].mxu0 %vm168_vm0, %v2266_v39 }
 0x787   :  { %v1770_v37 = vpop.f32.mrb[6].mxu1  ;;  %1782 = vmatprep.mubr.msk.f32.mxu0 %vm168_vm0, %v2268_v41 }
 0x788   :  { %v913_v24 = vadd.f32 %v1770_v37, %v1471_v44  ;;  %v907_v29 = vpop.f32.mrb[7].mxu1 }
 0x789   :  { %v908_v30 = vadd.f32 %v1471_v44, %v907_v29  ;;  %v1289_v29 = vld [vmem:[#allocation7 + $0x280] sm:$0xff] }
 0x78b   :  { %v1939_v47 = vpack.c.bf16 %v913_v24, %v908_v30  ;;  %v2175_v24 = vmov 5   ;;  %v1290_v30 = vld [vmem:[#allocation7 + $0x288] sm:$0xff] }
 0x78d   :  { %1940 = vmatprep.subr.bf16.mxu0 %v1939_v47 }
 0x78e   :  { %1942 = vmatpush3.bf16.msra.mxu0 %v1939_v47  ;;  %v1273_v47 = vld [vmem:[#allocation7 + $0x200] sm:$0xff] }
 0x78f   :  { %1944 = vmatprep.subr.bf16.mxu0 %v1943_v46 }
 0x791   :  { %1783 = vmatmul.mubr.msk.f32.vlgmr.msra.gmra.mrb[14].mxu0 %vm168_vm0, %v2274_v42 }
 0x792   :  { %1817 = vmatprep.mubr.f32.mxu0 %v2250_v9  ;;  %1946 = vmatpush3.bf16.msra.mxu0 %v1943_v46  ;;  %v1275_v46 = vld [vmem:[#allocation7 + $0x210] sm:$0xff] }
 0x793   :  { %1948 = vmatprep.subr.bf16.mxu0 %v1947_v52  ;;  %v1981_v55 = vpack.c.bf16 %v1276_v48, %v1275_v46 }
 0x796   :  { %1950 = vmatpush3.bf16.msra.mxu0 %v1947_v52  ;;  %v1294_v52 = vld [vmem:[#allocation7 + $0x2a8] sm:$0xff] }
 0x797   :  { %1952 = vmatprep.subr.bf16.mxu0 %v1951_v57  ;;  %v1983_v56 = vpack.c.bf16 %v1294_v52, %v1293_v50 }
 0x79a   :  { %1954 = vmatpush3.bf16.msra.mxu0 %v1951_v57  ;;  %v1277_v57 = vld [vmem:[#allocation7 + $0x220] sm:$0xff] }
 0x79b   :  { %1956 = vmatprep.subr.bf16.mxu0 %v1955_v59  ;;  %v1985_v62 = vpack.c.bf16 %v1278_v58, %v1277_v57 }
 0x79e   :  { %1958 = vmatpush3.bf16.msra.mxu0 %v1955_v59  ;;  %v1295_v59 = vld [vmem:[#allocation7 + $0x2b0] sm:$0xff] }
 0x79f   :  { %1960 = vmatprep.subr.bf16.mxu0 %v1959_v63 }
 0x7a2   :  { %1962 = vmatpush3.bf16.msra.mxu0 %v1959_v63  ;;  %v1987_v63 = vpack.c.bf16 %v1296_v60, %v1295_v59 }
 0x7a3   :  { %1964 = vmatprep.subr.bf16.mxu0 %v1963_v3 }
 0x7a6   :  { %1966 = vmatpush3.bf16.msra.mxu0 %v1963_v3  ;;  %v1297_v3 = vld [vmem:[#allocation7 + $0x2c0] sm:$0xff] }
 0x7a7   :  { %1968 = vmatprep.subr.bf16.mxu0 %v1967_v6 }
 0x7aa   :  { %1970 = vmatpush3.bf16.msra.mxu0 %v1967_v6  ;;  %v1991_v6 = vpack.c.bf16 %v1298_v4, %v1297_v3 }
 0x7ab   :  { %1972 = vmatprep.subr.bf16.mxu0 %v1971_v10 }
 0x7ae   :  { %1974 = vmatpush3.bf16.msra.mxu0 %v1971_v10  ;;  %v1299_v10 = vld [vmem:[#allocation7 + $0x2d0] sm:$0xff] }
 0x7b1   :  { %1818 = vmatmul.mubr.f32.vlgmr.msra.gmra.mrb[16].mxu0 %v2253_v25 }
 0x7b2   :  { %1820 = vmatprep.mubr.f32.mxu0 %v2255_v26 }
 0x7b5   :  { %1821 = vmatmul.mubr.f32.gmra.mrb[18].mxu0 %v2259_v27 }
 0x859   :  { %v2380_v31 = vpop.f32.mrb[12].mxu0 }
 0x85a   :  { %v2382_v32 = vpop.f32.mrb[13].mxu0  ;;  %v1075_v34 = vmul.f32 %v2380_v31, %v2380_v31 }
 0x85b   :  { %1066 = vadd.xlane.f32.xlu0 %v2382_v32  ;;  %v1074_v39 = vmul.f32 %v2382_v32, %v2382_v32 }
 0x85f   :  { %1078 = vadd.xlane.f32.xlu0 %v1074_v39  ;;  %v1975_v39 = vpack.c.bf16 %v1290_v30, %v1289_v29 }
 0x861   :  { %1976 = vmatprep.subr.bf16.mxu1 %v1975_v39 }
 0x864   :  { %v2387_v41 = vpop.f32.mrb[14].mxu0 }
 0x865   :  { %1072 = vadd.xlane.f32.xlu0 %v2387_v41  ;;  %v2390_v33 = vpop.f32.mrb[15].mxu0  ;;  %v1077_v42 = vmul.f32 %v2387_v41, %v2387_v41 }
 0x866   :  { %1070 = vadd.xlane.f32.xlu1 %v2390_v33  ;;  %v1076_v9 = vmul.f32 %v2390_v33, %v2390_v33 }
 0x869   :  { %1082 = vadd.xlane.f32.xlu0 %v1076_v9  ;;  %v1274_v9 = vld [vmem:[#allocation7 + $0x208] sm:$0xff] }
 0x86a   :  { %1068 = vadd.xlane.f32.xlu1 %v2380_v31  ;;  %v1977_v38 = vpack.c.bf16 %v1274_v9, %v1273_v47 }
 0x86c   :  { %1978 = vmatpush3.bf16.msra.mxu1 %v1977_v38 }
 0x86d   :  { %1084 = vadd.xlane.f32.xlu0 %v1077_v42  ;;  %v1291_v42 = vld [vmem:[#allocation7 + $0x290] sm:$0xff] }
 0x86e   :  { %1080 = vadd.xlane.f32.xlu1 %v1075_v34  ;;  %v1292_v34 = vld [vmem:[#allocation7 + $0x298] sm:$0xff] }
 0x86f   :  { %v1979_v28 = vpack.c.bf16 %v1292_v34, %v1291_v42 }
 0x871   :  { %1980 = vmatprep.subr.bf16.mxu1 %v1979_v28 }
 0x872   :  { %1982 = vmatpush3.bf16.msra.mxu1 %v1981_v55 }
 0x873   :  { %1984 = vmatprep.subr.bf16.mxu1 %v1983_v56 }
 0x876   :  { %1986 = vmatpush3.bf16.msra.mxu1 %v1985_v62  ;;  %v1476_v62 = vld [vmem:[#allocation7 + $0x303] ss:$0 sm:$0xff] }
 0x877   :  { %1988 = vmatprep.subr.bf16.mxu1 %v1987_v63 }
 0x87a   :  { %1990 = vmatpush3.bf16.msra.mxu1 %v1989_v5 }
 0x87b   :  { %1992 = vmatprep.subr.bf16.mxu1 %v1991_v6 }
 0x8e8   :  { %v1067_v11 = vpop.xlane.xlu0 %1066 }
 0x8ec   :  { %v1079_v49 = vpop.xlane.xlu0 %1078 }
 0x8f2   :  { %v1073_v12 = vpop.xlane.xlu0 %1072 }
 0x8f3   :  { %v1071_v51 = vpop.xlane.xlu1 %1070 }
 0x8f4   :  { %v1086_v13 = vadd.f32 %v1071_v51, %v1067_v11  ;;  %v1300_v11 = vld [vmem:[#allocation7 + $0x2d8] sm:$0xff]  ;;  %v1283_v51 = vld [vmem:[#allocation7 + $0x250] sm:$0xff] }
 0x8f6   :  { %v1090_v14 = vmul.f32 0.03125, %v1086_v13  ;;  %v1083_v15 = vpop.xlane.xlu0 %1082  ;;  %v1284_v13 = vld [vmem:[#allocation7 + $0x258] sm:$0xff] }
 0x8f7   :  { %v1088_v36 = vadd.f32 %v1083_v15, %v1079_v49  ;;  %v1069_v16 = vpop.xlane.xlu1 %1068  ;;  %v1993_v49 = vpack.c.bf16 %v1282_v1, %v1281_v8  ;;  %v1302_v15 = vld [vmem:[#allocation7 + $0x2e8] sm:$0xff] }
 0x8f8   :  { %v1094_v43 = vmul.f32 %v1090_v14, %v1090_v14  ;;  %v1087_v17 = vadd.f32 %v1073_v12, %v1069_v16  ;;  %v1995_v12 = vpack.c.bf16 %v1300_v11, %v1299_v10 }
 0x8f9   :  { %v1092_v35 = vmul.f32 0.03125, %v1088_v36  ;;  %1994 = vmatpush3.bf16.msra.mxu1 %v1993_v49  ;;  %v1997_v36 = vpack.c.bf16 %v1284_v13, %v1283_v51 }
 0x8fa   :  { %v1091_v18 = vmul.f32 0.03125, %v1087_v17  ;;  %v1085_v20 = vpop.xlane.xlu0 %1084  ;;  %1996 = vmatprep.subr.bf16.mxu1 %v1995_v12  ;;  %v1286_v17 = vld [vmem:[#allocation7 + $0x268] sm:$0xff] }
 0x8fb   :  { %v1096_v44 = vsub.f32 %v1092_v35, %v1094_v43  ;;  %v1081_v25 = vpop.xlane.xlu1 %1080  ;;  %v1285_v43 = vld [vmem:[#allocation7 + $0x260] sm:$0xff] }
 0x8fc   :  { %v1089_v21 = vadd.f32 %v1085_v20, %v1081_v25  ;;  %v1095_v22 = vmul.f32 %v1091_v18, %v1091_v18  ;;  %v2001_v35 = vpack.c.bf16 %v1286_v17, %v1285_v43  ;;  %v1304_v25 = vld [vmem:[#allocation7 + $0x2f8] sm:$0xff] }
 0x8fd   :  { %v1098_v26 = vadd.f32 1e-05, %v1096_v44  ;;  %1998 = vmatpush3.bf16.msra.mxu1 %v1997_v36  ;;  %v1303_v44 = vld [vmem:[#allocation7 + $0x2f0] sm:$0xff] }
 0x8fe   :  { %v1093_v27 = vmul.f32 0.03125, %v1089_v21  ;;  %v2003_v21 = vpack.c.bf16 %v1304_v25, %v1303_v44 }
 0x8ff   :  { %2050 = vrsqrt.f32 %v1098_v26  ;;  %v1287_v26 = vld [vmem:[#allocation7 + $0x270] sm:$0xff] }
 0x900   :  { %v1097_v45 = vsub.f32 %v1093_v27, %v1095_v22  ;;  %v1288_v22 = vld [vmem:[#allocation7 + $0x278] sm:$0xff] }
 0x901   :  { %v2005_v27 = vpack.c.bf16 %v1288_v22, %v1287_v26 }
 0x902   :  { %v1099_v23 = vadd.f32 1e-05, %v1097_v45 }
 0x904   :  { %2052 = vrsqrt.f32 %v1099_v23 }
 0x909   :  { %v2051_v40 = vpop.eup %2050 }
 0x90a   :  { %1118 = vrot.lane.b32.xlu1 %v2051_v40, %s2174_s21 }
 0x90e   :  { %v2053_v37 = vpop.eup %2052  ;;  %1104 = vperm.xlu1 %2034, %v1090_v14   ;;  %v1301_v14 = vld [vmem:[#allocation7 + $0x2e0] sm:$0xff] }
 0x90f   :  { %1120 = vrot.lane.b32.xlu0 %v2053_v37, %s2174_s21  ;;  %v1999_v16 = vpack.c.bf16 %v1302_v15, %v1301_v14  ;;  %v2410_v37 = vpop.f32.mrb[16].mxu0 }
 0x910   :  { %v2412_v29 = vpop.f32.mrb[17].mxu0 }
 0x911   :  { %2000 = vmatprep.subr.bf16.mxu1 %v1999_v16  ;;  %v2418_v30 = vpop.f32.mrb[18].mxu0 }
 0x912   :  { %2036 = vset.pattern.permute.xlu1 %v2175_v24  ;;  %2002 = vmatpush3.bf16.msra.mxu1 %v2001_v35 }
 0x913   :  { %1109 = vperm.xlu0 %2035, %v1091_v18   ;;  %1153 = vperm.xlu1 %2036, %v2302_v61  }
 0x914   :  { %2004 = vmatprep.subr.bf16.mxu1 %v2003_v21 }
 0x916   :  { %2006 = vmatpush3.bf16.msra.mxu1 %v2005_v27 }
 0x917   :  { %2037 = vset.pattern.permute.xlu1 %v2176_v54  ;;  %2038 = vset.pattern.permute.xlu0 %v2175_v24 }
 0x918   :  { %1157 = vperm.xlu0 %2038, %v2306_v7  }
 0x91c   :  { %2040 = vset.pattern.permute.xlu0 %v2176_v54 }
 0x97c   :  { %v1119_v18 = vpop.permute.xlu1 %1118 }
 0x97d   :  { %v1124_v20 = vmul.f32 %v1119_v18, %v2302_v61  ;;  %v1126_v61 = vmul.f32 %v1119_v18, %v2317_v53 }
 0x97f   :  { %1130 = vperm.xlu1 %2037, %v1124_v20  }
 0x981   :  { %v1121_v45 = vpop.permute.xlu0 %1120 }
 0x982   :  { %v1125_v23 = vmul.f32 %v1121_v45, %v2306_v7  ;;  %v1127_v40 = vmul.f32 %v1121_v45, %v2309_v19  ;;  %v2420_v7 = vpop.f32.mrb[19].mxu0 }
 0x984   :  { %1145 = vperm.xlu0 %2040, %v1127_v40   ;;  %1135 = vperm.xlu1 %2037, %v1125_v23  }
 0x988   :  { %1140 = vperm.xlu1 %2037, %v1126_v61   ;;  %2041 = vset.pattern.permute.xlu0 %v2175_v24 }
 0x98c   :  { %2039 = vset.pattern.permute.xlu1 %v2175_v24 }
 0x98d   :  { %1161 = vperm.xlu1 %2039, %v2317_v53   ;;  %v1105_v47 = vpop.permute.xlu1 %1104 }
 0x98e   :  { %v1112_v9 = vsub.f32 %v2382_v32, %v1105_v47 }
 0x991   :  { %1165 = vperm.xlu1 %2039, %v2309_v19   ;;  %v1114_v19 = vsub.f32 %v2390_v33, %v1105_v47 }
 0x992   :  { %v1154_v39 = vpop.permute.xlu1 %1153  ;;  %v1110_v34 = vpop.permute.xlu0 %1109 }
 0x993   :  { %v1113_v46 = vsub.f32 %v2380_v31, %v1110_v34  ;;  %v1115_v56 = vsub.f32 %v2387_v41, %v1110_v34 }
 0x997   :  { %v1158_v53 = vpop.permute.xlu0 %1157 }
 0x9fe   :  { %v1131_v42 = vpop.permute.xlu1 %1130 }
 0x9ff   :  { %v1148_v38 = vmul.f32 %v1131_v42, %v1112_v9 }
 0xa01   :  { %v1168_v28 = vadd.f32 %v1154_v39, %v1148_v38 }
 0xa03   :  { %1374 = vmatprep.mubr.f32.mxu1 %v1168_v28  ;;  %v1136_v24 = vpop.permute.xlu1 %1135  ;;  %v1146_v54 = vpop.permute.xlu0 %1145 }
 0xa04   :  { %v1149_v48 = vmul.f32 %v1136_v24, %v1113_v46  ;;  %1375 = vmatmul.mubr.f32.vlgmr.msra.gmra.mrb[8].mxu1 %v2412_v29  ;;  %v1151_v31 = vmul.f32 %v1146_v54, %v1115_v56 }
 0xa06   :  { %v1169_v50 = vadd.f32 %v1158_v53, %v1149_v48 }
 0xa07   :  { %v1141_v52 = vpop.permute.xlu1 %1140 }
 0xa08   :  { %1379 = vmatprep.mubr.f32.mxu1 %v1169_v50  ;;  %v1150_v32 = vmul.f32 %v1141_v52, %v1114_v19 }
 0xa09   :  { %1380 = vmatmul.mubr.f32.gmra.mrb[10].mxu1 %v2410_v37 }
 0xa0c   :  { %v1162_v55 = vpop.permute.xlu1 %1161 }
 0xa0d   :  { %v1170_v57 = vadd.f32 %v1162_v55, %v1150_v32 }
 0xa0f   :  { %1384 = vmatprep.mubr.f32.mxu1 %v1170_v57 }
 0xa10   :  { %v1166_v58 = vpop.permute.xlu1 %1165  ;;  %1385 = vmatmul.mubr.f32.gmra.mrb[12].mxu1 %v2420_v7 }
 0xa11   :  { %v1171_v59 = vadd.f32 %v1166_v58, %v1151_v31 }
 0xa13   :  { %1389 = vmatprep.mubr.f32.mxu1 %v1171_v59 }
 0xa14   :  { %1390 = vmatmul.mubr.f32.gmra.mrb[14].mxu1 %v2418_v30 }
 0xad7   :  { %v1617_v60 = vpop.f32.mrb[8].mxu1 }
 0xad8   :  { %v1618_v33 = vpop.f32.mrb[9].mxu1 }
 0xad9   :  { %v1619_v63 = vadd.f32 %v1618_v33, %v1617_v60 }
 0xadb   :  { %v1377_v0 = vadd.f32 %v1619_v63, %v1476_v62 }
 0xadc   :  { %v1620_v2 = vpop.f32.mrb[10].mxu1 }
 0xadd   :  { %v1477_v3 = vmul.f32 -1.442695, %v1377_v0  ;;  %v1621_v4 = vpop.f32.mrb[11].mxu1 }
 0xade   :  { %v1622_v5 = vadd.f32 %v1621_v4, %v1620_v2 }
 0xadf   :  { %2054 = vpow2.f32 %v1477_v3 }
 0xae0   :  { %v1382_v41 = vadd.f32 %v1622_v5, %v1476_v62 }
 0xae2   :  { %v1478_v6 = vmul.f32 -1.442695, %v1382_v41 }
 0xae3   :  { %v1623_v8 = vpop.f32.mrb[12].mxu1 }
 0xae4   :  { %2056 = vpow2.f32 %v1478_v6  ;;  %v1624_v1 = vpop.f32.mrb[13].mxu1 }
 0xae5   :  { %v1625_v10 = vadd.f32 %v1624_v1, %v1623_v8 }
 0xae7   :  { %v1387_v11 = vadd.f32 %v1625_v10, %v1476_v62  ;;  %v1626_v49 = vpop.f32.mrb[14].mxu1 }
 0xae8   :  { %v1627_v12 = vpop.f32.mrb[15].mxu1 }
 0xae9   :  { %v2055_v51 = vpop.eup %2054  ;;  %v1479_v13 = vmul.f32 -1.442695, %v1387_v11  ;;  %v1628_v14 = vadd.f32 %v1627_v12, %v1626_v49 }
 0xaea   :  { %v1407_v15 = vadd.f32 1.0, %v2055_v51 }
 0xaeb   :  { %2058 = vpow2.f32 %v1479_v13  ;;  %v1392_v36 = vadd.f32 %v1628_v14, %v1476_v62 }
 0xaec   :  { %2060 = vrcp.f32 %v1407_v15 }
 0xaed   :  { %v1480_v16 = vmul.f32 -1.442695, %v1392_v36 }
 0xaee   :  { %v2057_v43 = vpop.eup %2056 }
 0xaef   :  { %v1408_v17 = vadd.f32 1.0, %v2057_v43  ;;  %2062 = vpow2.f32 %v1480_v16 }
 0xaf1   :  { %2064 = vrcp.f32 %v1408_v17 }
 0xaf5   :  { %v2059_v35 = vpop.eup %2058 }
 0xaf6   :  { %v2061_v18 = vpop.eup %2060  ;;  %v1409_v20 = vadd.f32 1.0, %v2059_v35 }
 0xaf7   :  { %v1423_v44 = vsub.f32 1.0, %v2061_v18  ;;  %v1419_v21 = vmul.f32 %v2061_v18, %v1168_v28 }
 0xaf8   :  { %2066 = vrcp.f32 %v1409_v20 }
 0xaf9   :  { %v2063_v25 = vpop.eup %2062  ;;  %v1427_v26 = vmul.f32 %v1423_v44, %v2412_v29 }
 0xafa   :  { %v1410_v22 = vadd.f32 1.0, %v2063_v25 }
 0xafb   :  { %v2065_v27 = vpop.eup %2064  ;;  %v1431_v45 = vadd.f32 %v1427_v26, %v1419_v21 }
 0xafc   :  { %2068 = vrcp.f32 %v1410_v22  ;;  %v1424_v23 = vsub.f32 1.0, %v2065_v27  ;;  %v1420_v61 = vmul.f32 %v2065_v27, %v1169_v50 }
 0xafd   :  { %v1435_v40 = vmax.f32 %v1431_v45, 0.0 }
 0xafe   :  { %v1428_v47 = vmul.f32 %v2410_v37, %v1424_v23 }
 0xaff   :  { %1439 = vst [vmem:[#allocation8] sm:$0xff] %v1435_v40 }
 0xb00   :  { %v1432_v39 = vadd.f32 %v1428_v47, %v1420_v61 }
 0xb02   :  { %v2067_v9 = vpop.eup %2066  ;;  %v1436_v42 = vmax.f32 %v1432_v39, 0.0 }
 0xb03   :  { %v1425_v34 = vsub.f32 1.0, %v2067_v9  ;;  %v1421_v38 = vmul.f32 %v2067_v9, %v1170_v57 }
 0xb04   :  { %1440 = vst [vmem:[#allocation8 + $0x8] sm:$0xff] %v1436_v42 }
 0xb05   :  { %v1429_v28 = vmul.f32 %v1425_v34, %v2420_v7 }
 0xb06   :  { %v2069_v46 = vpop.eup %2068 }
 0xb07   :  { %v1426_v29 = vsub.f32 1.0, %v2069_v46  ;;  %v1433_v24 = vadd.f32 %v1429_v28, %v1421_v38  ;;  %v1422_v48 = vmul.f32 %v2069_v46, %v1171_v59 }
 0xb09   :  { %v1430_v53 = vmul.f32 %v2418_v30, %v1426_v29  ;;  %v1437_v52 = vmax.f32 %v1433_v24, 0.0 }
 0xb0b   :  { %v1434_v50 = vadd.f32 %v1430_v53, %v1422_v48  ;;  %1441 = vst [vmem:[#allocation8 + $0x10] sm:$0xff] %v1437_v52 }
 0xb0d   :  { %v1438_v37 = vmax.f32 %v1434_v50, 0.0 }
 0xb0f   :  { %1442 = vst [vmem:[#allocation8 + $0x18] sm:$0xff] %v1438_v37 }
 0xb10   :  { %2147 = shalt.err (!%p2144_p0)
}
 0xb11   :  { %s2148_s29 = scalar_lea.hbm %s2453_s3, 512 }
 0xb12   :  { %p2149_p1 = scmp.ne.s32.totalorder %s2453_s3, %s2148_s29  ;;  %p2152_p2 = scmp.lt.u32.totalorder %s2148_s29, %s2453_s3 }
 0xb14   :  { %p2154_p3 = pnand %p2152_p2, %p2149_p1 }
 0xb16   :  { %2157 = shalt.err (!%p2154_p3)
}
 0xb17   :  { %1454 = dma.vmem_to_hbm [thread:$0]  %s1449_s23, 512, %s2453_s3, [#allocation4], %s2166_s24, %s2166_s24, %s2167_s25  }
 0xb18   :  { %2162 = dma.done.wait [#allocation4], 512  }
 0xb19   :  { %2163 = vsyncadd [#allocation4], 4294966784 }
 0xb1a   :  { %1458 = vsyncpa [#allocation3], 1 }
 0xb1b   :  { %1459 = vsyncpa [#allocation6], 1 }
 0xb1c   :  { %1460 = vsyncpa [#allocation4], 1 }

</bundles_post_ra>
